<compile_context>
chip_gen: v7x
topology: tpu7x:2x2x1
jax: 0.10.0
libtpu: 0.0.40
codegen_flags: <defaults>
</compile_context>

<pallas_src>
import functools
import math

import jax
import jax.numpy as jnp
from jax.experimental import pallas as pl
from jax.experimental.pallas import tpu as pltpu

_HALO_PAD = 8   # sublane-aligned room in the conv scratch for the K-1 halo


# ----------------------------------------------------------------------------
# Kernel: one (batch element, sequence chunk) per grid step.
# ----------------------------------------------------------------------------
def mamba_block_kernel(x_ref, w_in_x_ref, w_in_z_ref, conv_w_ref, conv_b_ref,
                       w_delta_ref, w_b_ref, w_c_ref, dt_w_ref, dt_b_ref,
                       a_t_ref, d_ref, w_out_ref,
                       o_ref,
                       xpad_s, delta_s, bx_s, c_s, y_s, h_s,
                       *, scan_unroll):
    P = _HALO_PAD
    Lt = x_ref.shape[1]                 # chunk length (>= 8 >= K-1)
    N, Di = a_t_ref.shape               # d_state, d_inner (Di on lanes)
    K = conv_w_ref.shape[0]             # d_conv

    # ---- per-batch-element init (first chunk of the sequence) ---------------
    @pl.when(pl.program_id(1) == 0)
    def _():
        h_s[...] = jnp.zeros_like(h_s)
        xpad_s[P - (K - 1):P, :] = jnp.zeros((K - 1, Di), jnp.float32)

    x = x_ref[0].astype(jnp.float32)                                   # (Lt, E)

    # ---- in_proj (pre-split, no bias) ---------------------------------------
    xi = jnp.dot(x, w_in_x_ref[...], preferred_element_type=jnp.float32)  # (Lt, Di)
    z = jnp.dot(x, w_in_z_ref[...], preferred_element_type=jnp.float32)   # (Lt, Di)

    # ---- depthwise causal Conv1d + SiLU (halo carried across chunks) --------
    xpad_s[P:P + Lt, :] = xi                  # 8-aligned store of this chunk
    conv_w = conv_w_ref[...]                                           # (K, Di)
    base = P - (K - 1)
    acc = xpad_s[base:base + Lt, :] * conv_w[0:1, :]
    for k in range(1, K):                     # K is static (4)
        acc = acc + xpad_s[base + k:base + k + Lt, :] * conv_w[k:k + 1, :]
    xc = acc + conv_b_ref[...]
    xc = xc * jax.nn.sigmoid(xc)                                       # SiLU
    # Save the last K-1 rows of xi as the halo for the next chunk.
    xpad_s[base:P, :] = xpad_s[P + Lt - (K - 1):P + Lt, :]

    # ---- x_proj (pre-split) + dt_proj + softplus -----------------------------
    delta_low = jnp.dot(xc, w_delta_ref[...], preferred_element_type=jnp.float32)
    Bm = jnp.dot(xc, w_b_ref[...], preferred_element_type=jnp.float32)   # (Lt,N)
    Cm = jnp.dot(xc, w_c_ref[...], preferred_element_type=jnp.float32)   # (Lt,N)

    delta = jax.nn.softplus(
        jnp.dot(delta_low, dt_w_ref[...], preferred_element_type=jnp.float32)
        + dt_b_ref[...])                                               # (Lt, Di)

    # Stage scan inputs; everything keeps d_inner on the lane axis.
    delta_s[...] = delta
    c_s[...] = Cm
    bx_s[...] = (delta * xc)[:, None, :] * Bm[:, :, None]              # (Lt,N,Di)

    # ---- selective scan: h_t = exp(delta_t A) h_{t-1} + BX_t ; y_t = <h, C_t>
    a_t = a_t_ref[...]                                                 # (N, Di)

    def body(t, h):
        dA_t = jnp.exp(delta_s[pl.ds(t, 1), :] * a_t)                  # (N, Di)
        h = dA_t * h + bx_s[t]
        y_s[pl.ds(t, 1), :] = jnp.dot(c_s[pl.ds(t, 1), :], h,
                                      preferred_element_type=jnp.float32)
        return h

    h_s[...] = jax.lax.fori_loop(0, Lt, body, h_s[...], unroll=scan_unroll)

    # ---- y + D*x, gate with SiLU(z), out_proj --------------------------------
    y = y_s[...] + d_ref[...] * xc
    zg = z * jax.nn.sigmoid(z)
    out = jnp.dot(y * zg, w_out_ref[...], preferred_element_type=jnp.float32)
    o_ref[...] = out[None, :, :].astype(o_ref.dtype)


# ----------------------------------------------------------------------------
# Wrapper
# ----------------------------------------------------------------------------
def mamba_block_forward(x, params, *, chunk_l=128):
    B, L, E = x.shape
    Di, N = params["a_log"].shape
    R = params["dt_w"].shape[1]

    # -- pick a sequence chunk length (multiple of 8 that divides L) ----------
    if L <= chunk_l:
        lt = L
    else:
        lt = L
        for cand in range(chunk_l, 7, -8):
            if L % cand == 0:
                lt = cand
                break
    num_chunks = L // lt
    scan_unroll = 8 if lt % 8 == 0 else 1

    # -- trace-time parameter prep: split / transpose / precompute (free) -----
    w_in = params["w_in"]                     # (2*Di, E)
    w_in_x_t = w_in[:Di, :].T                 # (E, Di)
    w_in_z_t = w_in[Di:, :].T                 # (E, Di)
    w_x = params["w_x"]                       # (R + 2N, Di)
    w_delta_t = w_x[:R, :].T                  # (Di, R)
    w_b_t = w_x[R:R + N, :].T                 # (Di, N)
    w_c_t = w_x[R + N:, :].T                  # (Di, N)
    dt_w_t = params["dt_w"].T                 # (R, Di)
    a_t = (-jnp.exp(params["a_log"])).T       # (N, Di)  A = -exp(A_log), Di on lanes
    w_out_t = params["w_out"].T               # (Di, E)

    weights = [w_in_x_t, w_in_z_t, params["conv_w"], params["conv_b"],
               w_delta_t, w_b_t, w_c_t, dt_w_t, params["dt_b"],
               a_t, params["d"], w_out_t]

    def full_spec(a):
        return pl.BlockSpec(a.shape, lambda b, c, _nd=a.ndim: (0,) * _nd)

    # -- advisory cost estimate ------------------------------------------------
    mm_flops = 2 * B * L * (E * 2 * Di + Di * (R + 2 * N) + R * Di + Di * E
                            + N * Di)
    ew_flops = 10 * B * L * Di * (N + 1)
    cost = pl.CostEstimate(
        flops=int(mm_flops + ew_flops),
        transcendentals=int(B * L * Di * (N + 3)),
        bytes_accessed=int(4 * (2 * B * L * E + sum(int(w.size) for w in weights))))

    kernel = functools.partial(mamba_block_kernel, scan_unroll=scan_unroll)

    return pl.pallas_call(
        kernel,
        out_shape=jax.ShapeDtypeStruct((B, L, E), jnp.float32),
        grid_spec=pltpu.PrefetchScalarGridSpec(
            num_scalar_prefetch=0,
            grid=(B, num_chunks),
            in_specs=[pl.BlockSpec((1, lt, E), lambda b, c: (b, c, 0))]
                     + [full_spec(w) for w in weights],
            out_specs=pl.BlockSpec((1, lt, E), lambda b, c: (b, c, 0)),
            scratch_shapes=[
                pltpu.VMEM((_HALO_PAD + lt, Di), jnp.float32),  # conv input + halo
                pltpu.VMEM((lt, Di), jnp.float32),              # delta
                pltpu.VMEM((lt, N, Di), jnp.float32),           # BX (Di on lanes)
                pltpu.VMEM((lt, N), jnp.float32),               # C
                pltpu.VMEM((lt, Di), jnp.float32),              # y
                pltpu.VMEM((N, Di), jnp.float32),               # h (persistent)
            ]),
        compiler_params=pltpu.CompilerParams(
            dimension_semantics=("parallel", "arbitrary")),
        cost_estimate=cost,
    )(x, *weights)


# ----------------------------------------------------------------------------
# Deterministic parameter init (mirrors MambaBlock.__init__ shapes / init law)
# ----------------------------------------------------------------------------
def init_params(key, n_embd=32, d_state=16, d_conv=4, expand=2,
                dt_min=0.001, dt_max=0.1, dt_scale=1.0, dt_init_floor=1e-4):
    d_inner = expand * n_embd
    dt_rank = math.ceil(n_embd / 16)
    ks = jax.random.split(key, 7)

    def u(k, shape, bound):
        return jax.random.uniform(k, shape, jnp.float32, -bound, bound)

    w_in = u(ks[0], (2 * d_inner, n_embd), 1.0 / math.sqrt(n_embd))
    conv_w = u(ks[1], (d_conv, d_inner), 1.0 / math.sqrt(d_conv))   # (K, Di)
    conv_b = u(ks[2], (1, d_inner), 1.0 / math.sqrt(d_conv))
    w_x = u(ks[3], (dt_rank + 2 * d_state, d_inner), 1.0 / math.sqrt(d_inner))

    dt_init_std = dt_rank ** (-0.5) * dt_scale
    dt_w = u(ks[4], (d_inner, dt_rank), dt_init_std)
    dt = jnp.exp(jax.random.uniform(ks[5], (d_inner,), jnp.float32)
                 * (math.log(dt_max) - math.log(dt_min)) + math.log(dt_min))
    dt = jnp.maximum(dt, dt_init_floor)
    dt_b = (dt + jnp.log(-jnp.expm1(-dt))).reshape(1, d_inner)

    a_log = jnp.log(jnp.tile(jnp.arange(1, d_state + 1, dtype=jnp.float32),
                             (d_inner, 1)))
    d = jnp.ones((1, d_inner), jnp.float32)
    w_out = u(ks[6], (n_embd, d_inner), 1.0 / math.sqrt(d_inner))

    return dict(w_in=w_in, conv_w=conv_w, conv_b=conv_b, w_x=w_x, dt_w=dt_w,
                dt_b=dt_b, a_log=a_log, d=d, w_out=w_out)


# ----------------------------------------------------------------------------
# Pure-JAX reference (mirror of the PyTorch forward) for correctness check
# ----------------------------------------------------------------------------
def mamba_block_ref(x, p):
    B, L, E = x.shape
    Di, N = p["a_log"].shape
    R = p["dt_w"].shape[1]
    K = p["conv_w"].shape[0]

    xz = x @ p["w_in"].T
    xi, z = xz[..., :Di], xz[..., Di:]

    xpad = jnp.pad(xi, ((0, 0), (K - 1, 0), (0, 0)))
    xc = sum(xpad[:, k:k + L, :] * p["conv_w"][k][None, None, :]
             for k in range(K)) + p["conv_b"][None]
    xc = xc * jax.nn.sigmoid(xc)

    dbc = xc @ p["w_x"].T
    delta_low = dbc[..., :R]
    Bm = dbc[..., R:R + N]
    Cm = dbc[..., R + N:R + 2 * N]

    delta = jax.nn.softplus(delta_low @ p["dt_w"].T + p["dt_b"][None])
    A = -jnp.exp(p["a_log"])
    dA = jnp.exp(delta[..., None] * A)                       # (B, L, Di, N)
    bx = (delta * xc)[..., None] * Bm[:, :, None, :]         # (B, L, Di, N)

    h = jnp.zeros((B, Di, N), jnp.float32)
    ys = []
    for t in range(L):
        h = dA[:, t] * h + bx[:, t]
        ys.append(jnp.sum(h * Cm[:, t, None, :], axis=-1))
    y = jnp.stack(ys, axis=1) + p["d"][None] * xc

    zg = z * jax.nn.sigmoid(z)
    return (y * zg) @ p["w_out"].T


if __name__ == "__main__":
    key = jax.random.PRNGKey(0)
    k_x, k_p, k_x2 = jax.random.split(key, 3)

    batch, seq, n_embd = 2, 8, 32
    x = jax.random.normal(k_x, (batch, seq, n_embd), jnp.float32)
    params = init_params(k_p, n_embd=n_embd)

    out = jax.block_until_ready(mamba_block_forward(x, params))
    ref = jax.block_until_ready(mamba_block_ref(x, params))
    assert out.shape == (batch, seq, n_embd)
    # Tolerance covers XLA's default f32-matmul precision (bf16 passes) in the
    # reference vs. the MXU path inside the kernel; both sides are f32 math.
    err = float(jnp.max(jnp.abs(out - ref)))
    assert jnp.allclose(out, ref, rtol=1e-2, atol=1e-2), err

    # Exercise the chunked-sequence path: 4 chunks of 8 steps, which tests the
    # persistent hidden-state carry and the conv halo across chunk boundaries.
    seq2 = 32
    x2 = jax.random.normal(k_x2, (batch, seq2, n_embd), jnp.float32)
    out2 = jax.block_until_ready(mamba_block_forward(x2, params, chunk_l=8))
    ref2 = jax.block_until_ready(mamba_block_ref(x2, params))
    err2 = float(jnp.max(jnp.abs(out2 - ref2)))
    assert jnp.allclose(out2, ref2, rtol=1e-2, atol=1e-2), err2

    print("KERNEL_OK")
</pallas_src>

<mosaic_0001>
module attributes {stable_mosaic.version = 11 : i64} {
  func.func @mamba_block_kernel(%arg0: i32, %arg1: i32, %arg2: memref<1x8x32xf32, #tpu.memory_space<vmem>>, %arg3: memref<32x64xf32, #tpu.memory_space<vmem>>, %arg4: memref<32x64xf32, #tpu.memory_space<vmem>>, %arg5: memref<4x64xf32, #tpu.memory_space<vmem>>, %arg6: memref<1x64xf32, #tpu.memory_space<vmem>>, %arg7: memref<64x2xf32, #tpu.memory_space<vmem>>, %arg8: memref<64x16xf32, #tpu.memory_space<vmem>>, %arg9: memref<64x16xf32, #tpu.memory_space<vmem>>, %arg10: memref<2x64xf32, #tpu.memory_space<vmem>>, %arg11: memref<1x64xf32, #tpu.memory_space<vmem>>, %arg12: memref<16x64xf32, #tpu.memory_space<vmem>>, %arg13: memref<1x64xf32, #tpu.memory_space<vmem>>, %arg14: memref<64x32xf32, #tpu.memory_space<vmem>>, %arg15: memref<1x8x32xf32, #tpu.memory_space<vmem>>, %arg16: memref<16x64xf32, #tpu.memory_space<vmem>>, %arg17: memref<8x64xf32, #tpu.memory_space<vmem>>, %arg18: memref<8x16x64xf32, #tpu.memory_space<vmem>>, %arg19: memref<8x16xf32, #tpu.memory_space<vmem>>, %arg20: memref<8x64xf32, #tpu.memory_space<vmem>>, %arg21: memref<16x64xf32, #tpu.memory_space<vmem>>) attributes {dimension_semantics = [#tpu.dimension_semantics<parallel>, #tpu.dimension_semantics<arbitrary>], iteration_bounds = array<i64: 2, 1>, scalar_prefetch = 0 : i64, scratch_operands = 6 : i64, tpu.core_type = #tpu.core_type<tc>, window_params = [{transform_indices = @transform_0, window_bounds = array<i64: 1, 8, 32>}, {pipeline_mode = #tpu.pipeline_mode<synchronous>, transform_indices = @transform_1, window_bounds = array<i64: 32, 64>}, {pipeline_mode = #tpu.pipeline_mode<synchronous>, transform_indices = @transform_2, window_bounds = array<i64: 32, 64>}, {pipeline_mode = #tpu.pipeline_mode<synchronous>, transform_indices = @transform_3, window_bounds = array<i64: 4, 64>}, {pipeline_mode = #tpu.pipeline_mode<synchronous>, transform_indices = @transform_4, window_bounds = array<i64: 1, 64>}, {pipeline_mode = #tpu.pipeline_mode<synchronous>, transform_indices = @transform_5, window_bounds = array<i64: 64, 2>}, {pipeline_mode = #tpu.pipeline_mode<synchronous>, transform_indices = @transform_6, window_bounds = array<i64: 64, 16>}, {pipeline_mode = #tpu.pipeline_mode<synchronous>, transform_indices = @transform_7, window_bounds = array<i64: 64, 16>}, {pipeline_mode = #tpu.pipeline_mode<synchronous>, transform_indices = @transform_8, window_bounds = array<i64: 2, 64>}, {pipeline_mode = #tpu.pipeline_mode<synchronous>, transform_indices = @transform_9, window_bounds = array<i64: 1, 64>}, {pipeline_mode = #tpu.pipeline_mode<synchronous>, transform_indices = @transform_10, window_bounds = array<i64: 16, 64>}, {pipeline_mode = #tpu.pipeline_mode<synchronous>, transform_indices = @transform_11, window_bounds = array<i64: 1, 64>}, {pipeline_mode = #tpu.pipeline_mode<synchronous>, transform_indices = @transform_12, window_bounds = array<i64: 64, 32>}, {transform_indices = @transform_13, window_bounds = array<i64: 1, 8, 32>}]} {
    %c0_i32 = arith.constant 0 : i32
    %0 = arith.cmpi eq, %arg1, %c0_i32 : i32
    %1 = arith.extui %0 : i1 to i32
    %c0_i32_0 = arith.constant 0 : i32
    %2 = arith.cmpi ne, %1, %c0_i32_0 : i32
    scf.if %2 {
      %cst_111 = arith.constant 0.000000e+00 : f32
      %214 = vector.broadcast %cst_111 : f32 to vector<16x64xf32>
      %c0_112 = arith.constant 0 : index
      %c0_113 = arith.constant 0 : index
      %215 = vector.load %arg21[%c0_112, %c0_113] : memref<16x64xf32, #tpu.memory_space<vmem>>, vector<16x64xf32>
      tpu.vector_store %arg21[%c0_112, %c0_113], %214 {strides = array<i32>} : memref<16x64xf32, #tpu.memory_space<vmem>>, vector<16x64xf32>,
      %cst_114 = arith.constant 0.000000e+00 : f32
      %216 = vector.broadcast %cst_114 : f32 to vector<3x64xf32>
      %c5_115 = arith.constant 5 : index
      %c0_116 = arith.constant 0 : index
      %217 = vector.load %arg16[%c5_115, %c0_116] : memref<16x64xf32, #tpu.memory_space<vmem>>, vector<3x64xf32>
      tpu.vector_store %arg16[%c5_115, %c0_116], %216 {strides = array<i32>} : memref<16x64xf32, #tpu.memory_space<vmem>>, vector<3x64xf32>,
    } else {
    }
    %c0 = arith.constant 0 : index
    %c0_1 = arith.constant 0 : index
    %c0_2 = arith.constant 0 : index
    %3 = vector.load %arg2[%c0, %c0_1, %c0_2] : memref<1x8x32xf32, #tpu.memory_space<vmem>>, vector<1x8x32xf32>
    %4 = vector.shape_cast %3 : vector<1x8x32xf32> to vector<8x32xf32>
    %c0_3 = arith.constant 0 : index
    %c0_4 = arith.constant 0 : index
    %5 = vector.load %arg3[%c0_3, %c0_4] : memref<32x64xf32, #tpu.memory_space<vmem>>, vector<32x64xf32>
    %cst = arith.constant dense<0.000000e+00> : vector<8x64xf32>
    %6 = tpu.matmul %4, %5, %cst {dimension_numbers = #tpu.dot_dimension_numbers<[1], [0], [0], [1], [0, 0, 1, 1], [], []>} : vector<8x32xf32>, vector<32x64xf32>, vector<8x64xf32> -> vector<8x64xf32>
    %c0_5 = arith.constant 0 : index
    %c0_6 = arith.constant 0 : index
    %7 = vector.load %arg4[%c0_5, %c0_6] : memref<32x64xf32, #tpu.memory_space<vmem>>, vector<32x64xf32>
    %cst_7 = arith.constant dense<0.000000e+00> : vector<8x64xf32>
    %8 = tpu.matmul %4, %7, %cst_7 {dimension_numbers = #tpu.dot_dimension_numbers<[1], [0], [0], [1], [0, 0, 1, 1], [], []>} : vector<8x32xf32>, vector<32x64xf32>, vector<8x64xf32> -> vector<8x64xf32>
    %c8 = arith.constant 8 : index
    %c0_8 = arith.constant 0 : index
    %9 = vector.load %arg16[%c8, %c0_8] : memref<16x64xf32, #tpu.memory_space<vmem>>, vector<8x64xf32>
    tpu.vector_store %arg16[%c8, %c0_8], %6 {strides = array<i32>} : memref<16x64xf32, #tpu.memory_space<vmem>>, vector<8x64xf32>,
    %c0_9 = arith.constant 0 : index
    %c0_10 = arith.constant 0 : index
    %10 = vector.load %arg5[%c0_9, %c0_10] : memref<4x64xf32, #tpu.memory_space<vmem>>, vector<4x64xf32>
    %c5 = arith.constant 5 : index
    %c0_11 = arith.constant 0 : index
    %11 = vector.load %arg16[%c5, %c0_11] : memref<16x64xf32, #tpu.memory_space<vmem>>, vector<8x64xf32>
    %12 = vector.extract_strided_slice %10 {offsets = [0, 0], sizes = [1, 64], strides = [1, 1]} : vector<4x64xf32> to vector<1x64xf32>
    %13 = vector.broadcast %12 : vector<1x64xf32> to vector<8x64xf32>
    %14 = arith.mulf %11, %13 : vector<8x64xf32>
    %c6 = arith.constant 6 : index
    %c0_12 = arith.constant 0 : index
    %15 = vector.load %arg16[%c6, %c0_12] : memref<16x64xf32, #tpu.memory_space<vmem>>, vector<8x64xf32>
    %16 = vector.extract_strided_slice %10 {offsets = [1, 0], sizes = [1, 64], strides = [1, 1]} : vector<4x64xf32> to vector<1x64xf32>
    %17 = vector.broadcast %16 : vector<1x64xf32> to vector<8x64xf32>
    %18 = arith.mulf %15, %17 : vector<8x64xf32>
    %19 = arith.addf %14, %18 : vector<8x64xf32>
    %c7 = arith.constant 7 : index
    %c0_13 = arith.constant 0 : index
    %20 = vector.load %arg16[%c7, %c0_13] : memref<16x64xf32, #tpu.memory_space<vmem>>, vector<8x64xf32>
    %21 = vector.extract_strided_slice %10 {offsets = [2, 0], sizes = [1, 64], strides = [1, 1]} : vector<4x64xf32> to vector<1x64xf32>
    %22 = vector.broadcast %21 : vector<1x64xf32> to vector<8x64xf32>
    %23 = arith.mulf %20, %22 : vector<8x64xf32>
    %24 = arith.addf %19, %23 : vector<8x64xf32>
    %c8_14 = arith.constant 8 : index
    %c0_15 = arith.constant 0 : index
    %25 = vector.load %arg16[%c8_14, %c0_15] : memref<16x64xf32, #tpu.memory_space<vmem>>, vector<8x64xf32>
    %26 = vector.extract_strided_slice %10 {offsets = [3, 0], sizes = [1, 64], strides = [1, 1]} : vector<4x64xf32> to vector<1x64xf32>
    %27 = vector.broadcast %26 : vector<1x64xf32> to vector<8x64xf32>
    %28 = arith.mulf %25, %27 : vector<8x64xf32>
    %29 = arith.addf %24, %28 : vector<8x64xf32>
    %c0_16 = arith.constant 0 : index
    %c0_17 = arith.constant 0 : index
    %30 = vector.load %arg6[%c0_16, %c0_17] : memref<1x64xf32, #tpu.memory_space<vmem>>, vector<1x64xf32>
    %31 = vector.broadcast %30 : vector<1x64xf32> to vector<8x64xf32>
    %32 = arith.addf %29, %31 : vector<8x64xf32>
    %33 = arith.negf %32 : vector<8x64xf32>
    %34 = math.exp %33 : vector<8x64xf32>
    %cst_18 = arith.constant 1.000000e+00 : f32
    %35 = vector.broadcast %cst_18 : f32 to vector<8x64xf32>
    %36 = arith.addf %35, %34 : vector<8x64xf32>
    %37 = arith.divf %35, %36 : vector<8x64xf32>
    %38 = arith.mulf %32, %37 : vector<8x64xf32>
    %c13 = arith.constant 13 : index
    %c0_19 = arith.constant 0 : index
    %39 = vector.load %arg16[%c13, %c0_19] : memref<16x64xf32, #tpu.memory_space<vmem>>, vector<3x64xf32>
    %c5_20 = arith.constant 5 : index
    %c0_21 = arith.constant 0 : index
    %40 = vector.load %arg16[%c5_20, %c0_21] : memref<16x64xf32, #tpu.memory_space<vmem>>, vector<3x64xf32>
    tpu.vector_store %arg16[%c5_20, %c0_21], %39 {strides = array<i32>} : memref<16x64xf32, #tpu.memory_space<vmem>>, vector<3x64xf32>,
    %c0_22 = arith.constant 0 : index
    %c0_23 = arith.constant 0 : index
    %41 = vector.load %arg7[%c0_22, %c0_23] : memref<64x2xf32, #tpu.memory_space<vmem>>, vector<64x2xf32>
    %cst_24 = arith.constant dense<0.000000e+00> : vector<8x2xf32>
    %42 = tpu.matmul %38, %41, %cst_24 {dimension_numbers = #tpu.dot_dimension_numbers<[1], [0], [0], [1], [0, 0, 1, 1], [], []>} : vector<8x64xf32>, vector<64x2xf32>, vector<8x2xf32> -> vector<8x2xf32>
    %c0_25 = arith.constant 0 : index
    %c0_26 = arith.constant 0 : index
    %43 = vector.load %arg8[%c0_25, %c0_26] : memref<64x16xf32, #tpu.memory_space<vmem>>, vector<64x16xf32>
    %cst_27 = arith.constant dense<0.000000e+00> : vector<8x16xf32>
    %44 = tpu.matmul %38, %43, %cst_27 {dimension_numbers = #tpu.dot_dimension_numbers<[1], [0], [0], [1], [0, 0, 1, 1], [], []>} : vector<8x64xf32>, vector<64x16xf32>, vector<8x16xf32> -> vector<8x16xf32>
    %c0_28 = arith.constant 0 : index
    %c0_29 = arith.constant 0 : index
    %45 = vector.load %arg9[%c0_28, %c0_29] : memref<64x16xf32, #tpu.memory_space<vmem>>, vector<64x16xf32>
    %cst_30 = arith.constant dense<0.000000e+00> : vector<8x16xf32>
    %46 = tpu.matmul %38, %45, %cst_30 {dimension_numbers = #tpu.dot_dimension_numbers<[1], [0], [0], [1], [0, 0, 1, 1], [], []>} : vector<8x64xf32>, vector<64x16xf32>, vector<8x16xf32> -> vector<8x16xf32>
    %c0_31 = arith.constant 0 : index
    %c0_32 = arith.constant 0 : index
    %47 = vector.load %arg10[%c0_31, %c0_32] : memref<2x64xf32, #tpu.memory_space<vmem>>, vector<2x64xf32>
    %cst_33 = arith.constant dense<0.000000e+00> : vector<8x64xf32>
    %48 = tpu.matmul %42, %47, %cst_33 {dimension_numbers = #tpu.dot_dimension_numbers<[1], [0], [0], [1], [0, 0, 1, 1], [], []>} : vector<8x2xf32>, vector<2x64xf32>, vector<8x64xf32> -> vector<8x64xf32>
    %c0_34 = arith.constant 0 : index
    %c0_35 = arith.constant 0 : index
    %49 = vector.load %arg11[%c0_34, %c0_35] : memref<1x64xf32, #tpu.memory_space<vmem>>, vector<1x64xf32>
    %50 = vector.broadcast %49 : vector<1x64xf32> to vector<8x64xf32>
    %51 = arith.addf %48, %50 : vector<8x64xf32>
    %cst_36 = arith.constant 0.000000e+00 : f32
    %52 = vector.broadcast %cst_36 : f32 to vector<8x64xf32>
    %53 = arith.maximumf %51, %52 : vector<8x64xf32>
    %54 = vector.broadcast %cst_36 : f32 to vector<8x64xf32>
    %55 = arith.subf %51, %54 : vector<8x64xf32>
    %56 = arith.cmpf one, %55, %55 : vector<8x64xf32>
    %57 = vector.broadcast %cst_36 : f32 to vector<8x64xf32>
    %58 = arith.addf %51, %57 : vector<8x64xf32>
    %59 = math.absf %55 : vector<8x64xf32>
    %cst_37 = arith.constant 0.000000e+00 : f32
    %60 = vector.broadcast %cst_37 : f32 to vector<8x64xf32>
    %61 = arith.subf %60, %59 : vector<8x64xf32>
    %62 = math.exp %61 : vector<8x64xf32>
    %63 = math.log1p %62 : vector<8x64xf32>
    %64 = arith.addf %53, %63 : vector<8x64xf32>
    %65 = arith.select %56, %58, %64 : vector<8x64xi1>, vector<8x64xf32>
    %c0_38 = arith.constant 0 : index
    %c0_39 = arith.constant 0 : index
    %66 = vector.load %arg17[%c0_38, %c0_39] : memref<8x64xf32, #tpu.memory_space<vmem>>, vector<8x64xf32>
    tpu.vector_store %arg17[%c0_38, %c0_39], %65 {strides = array<i32>} : memref<8x64xf32, #tpu.memory_space<vmem>>, vector<8x64xf32>,
    %c0_40 = arith.constant 0 : index
    %c0_41 = arith.constant 0 : index
    %67 = vector.load %arg19[%c0_40, %c0_41] : memref<8x16xf32, #tpu.memory_space<vmem>>, vector<8x16xf32>
    tpu.vector_store %arg19[%c0_40, %c0_41], %46 {strides = array<i32>} : memref<8x16xf32, #tpu.memory_space<vmem>>, vector<8x16xf32>,
    %68 = arith.mulf %65, %38 : vector<8x64xf32>
    %69 = vector.shape_cast %68 : vector<8x64xf32> to vector<8x1x64xf32>
    %70 = vector.shape_cast %44 : vector<8x16xf32> to vector<8x16x1xf32>
    %71 = vector.broadcast %69 : vector<8x1x64xf32> to vector<8x16x64xf32>
    %72 = vector.broadcast %70 : vector<8x16x1xf32> to vector<8x16x64xf32>
    %73 = arith.mulf %71, %72 : vector<8x16x64xf32>
    %c0_42 = arith.constant 0 : index
    %c0_43 = arith.constant 0 : index
    %c0_44 = arith.constant 0 : index
    %74 = vector.load %arg18[%c0_42, %c0_43, %c0_44] : memref<8x16x64xf32, #tpu.memory_space<vmem>>, vector<8x16x64xf32>
    tpu.vector_store %arg18[%c0_42, %c0_43, %c0_44], %73 {strides = array<i32>} : memref<8x16x64xf32, #tpu.memory_space<vmem>>, vector<8x16x64xf32>,
    %c0_45 = arith.constant 0 : index
    %c0_46 = arith.constant 0 : index
    %75 = vector.load %arg12[%c0_45, %c0_46] : memref<16x64xf32, #tpu.memory_space<vmem>>, vector<16x64xf32>
    %c0_47 = arith.constant 0 : index
    %c0_48 = arith.constant 0 : index
    %76 = vector.load %arg21[%c0_47, %c0_48] : memref<16x64xf32, #tpu.memory_space<vmem>>, vector<16x64xf32>
    %c0_i32_49 = arith.constant 0 : i32
    %77 = arith.index_cast %c0_i32_49 : i32 to index
    %c0_50 = arith.constant 0 : index
    %78 = vector.load %arg17[%77, %c0_50] : memref<8x64xf32, #tpu.memory_space<vmem>>, vector<1x64xf32>
    %79 = vector.broadcast %78 : vector<1x64xf32> to vector<16x64xf32>
    %80 = arith.mulf %79, %75 : vector<16x64xf32>
    %81 = math.exp %80 : vector<16x64xf32>
    %82 = arith.mulf %81, %76 : vector<16x64xf32>
    %83 = arith.index_cast %c0_i32_49 : i32 to index
    %c0_51 = arith.constant 0 : index
    %c0_52 = arith.constant 0 : index
    %84 = vector.load %arg18[%83, %c0_51, %c0_52] : memref<8x16x64xf32, #tpu.memory_space<vmem>>, vector<1x16x64xf32>
    %85 = vector.shape_cast %84 : vector<1x16x64xf32> to vector<16x64xf32>
    %86 = arith.addf %82, %85 : vector<16x64xf32>
    %87 = arith.index_cast %c0_i32_49 : i32 to index
    %c0_53 = arith.constant 0 : index
    %88 = vector.load %arg19[%87, %c0_53] : memref<8x16xf32, #tpu.memory_space<vmem>>, vector<1x16xf32>
    %cst_54 = arith.constant dense<0.000000e+00> : vector<1x64xf32>
    %89 = tpu.matmul %88, %86, %cst_54 {dimension_numbers = #tpu.dot_dimension_numbers<[1], [0], [0], [1], [0, 0, 1, 1], [], []>} : vector<1x16xf32>, vector<16x64xf32>, vector<1x64xf32> -> vector<1x64xf32>
    %90 = arith.index_cast %c0_i32_49 : i32 to index
    %c0_55 = arith.constant 0 : index
    %91 = vector.load %arg20[%90, %c0_55] : memref<8x64xf32, #tpu.memory_space<vmem>>, vector<1x64xf32>
    tpu.vector_store %arg20[%90, %c0_55], %89 {strides = array<i32>} : memref<8x64xf32, #tpu.memory_space<vmem>>, vector<1x64xf32>,
    %c1_i32 = arith.constant 1 : i32
    %92 = arith.index_cast %c1_i32 : i32 to index
    %c0_56 = arith.constant 0 : index
    %93 = vector.load %arg17[%92, %c0_56] : memref<8x64xf32, #tpu.memory_space<vmem>>, vector<1x64xf32>
    %94 = vector.broadcast %93 : vector<1x64xf32> to vector<16x64xf32>
    %95 = arith.mulf %94, %75 : vector<16x64xf32>
    %96 = math.exp %95 : vector<16x64xf32>
    %97 = arith.mulf %96, %86 : vector<16x64xf32>
    %98 = arith.index_cast %c1_i32 : i32 to index
    %c0_57 = arith.constant 0 : index
    %c0_58 = arith.constant 0 : index
    %99 = vector.load %arg18[%98, %c0_57, %c0_58] : memref<8x16x64xf32, #tpu.memory_space<vmem>>, vector<1x16x64xf32>
    %100 = vector.shape_cast %99 : vector<1x16x64xf32> to vector<16x64xf32>
    %101 = arith.addf %97, %100 : vector<16x64xf32>
    %102 = arith.index_cast %c1_i32 : i32 to index
    %c0_59 = arith.constant 0 : index
    %103 = vector.load %arg19[%102, %c0_59] : memref<8x16xf32, #tpu.memory_space<vmem>>, vector<1x16xf32>
    %cst_60 = arith.constant dense<0.000000e+00> : vector<1x64xf32>
    %104 = tpu.matmul %103, %101, %cst_60 {dimension_numbers = #tpu.dot_dimension_numbers<[1], [0], [0], [1], [0, 0, 1, 1], [], []>} : vector<1x16xf32>, vector<16x64xf32>, vector<1x64xf32> -> vector<1x64xf32>
    %105 = arith.index_cast %c1_i32 : i32 to index
    %c0_61 = arith.constant 0 : index
    %106 = vector.load %arg20[%105, %c0_61] : memref<8x64xf32, #tpu.memory_space<vmem>>, vector<1x64xf32>
    tpu.vector_store %arg20[%105, %c0_61], %104 {strides = array<i32>} : memref<8x64xf32, #tpu.memory_space<vmem>>, vector<1x64xf32>,
    %c2_i32 = arith.constant 2 : i32
    %107 = arith.index_cast %c2_i32 : i32 to index
    %c0_62 = arith.constant 0 : index
    %108 = vector.load %arg17[%107, %c0_62] : memref<8x64xf32, #tpu.memory_space<vmem>>, vector<1x64xf32>
    %109 = vector.broadcast %108 : vector<1x64xf32> to vector<16x64xf32>
    %110 = arith.mulf %109, %75 : vector<16x64xf32>
    %111 = math.exp %110 : vector<16x64xf32>
    %112 = arith.mulf %111, %101 : vector<16x64xf32>
    %113 = arith.index_cast %c2_i32 : i32 to index
    %c0_63 = arith.constant 0 : index
    %c0_64 = arith.constant 0 : index
    %114 = vector.load %arg18[%113, %c0_63, %c0_64] : memref<8x16x64xf32, #tpu.memory_space<vmem>>, vector<1x16x64xf32>
    %115 = vector.shape_cast %114 : vector<1x16x64xf32> to vector<16x64xf32>
    %116 = arith.addf %112, %115 : vector<16x64xf32>
    %117 = arith.index_cast %c2_i32 : i32 to index
    %c0_65 = arith.constant 0 : index
    %118 = vector.load %arg19[%117, %c0_65] : memref<8x16xf32, #tpu.memory_space<vmem>>, vector<1x16xf32>
    %cst_66 = arith.constant dense<0.000000e+00> : vector<1x64xf32>
    %119 = tpu.matmul %118, %116, %cst_66 {dimension_numbers = #tpu.dot_dimension_numbers<[1], [0], [0], [1], [0, 0, 1, 1], [], []>} : vector<1x16xf32>, vector<16x64xf32>, vector<1x64xf32> -> vector<1x64xf32>
    %120 = arith.index_cast %c2_i32 : i32 to index
    %c0_67 = arith.constant 0 : index
    %121 = vector.load %arg20[%120, %c0_67] : memref<8x64xf32, #tpu.memory_space<vmem>>, vector<1x64xf32>
    tpu.vector_store %arg20[%120, %c0_67], %119 {strides = array<i32>} : memref<8x64xf32, #tpu.memory_space<vmem>>, vector<1x64xf32>,
    %c3_i32 = arith.constant 3 : i32
    %122 = arith.index_cast %c3_i32 : i32 to index
    %c0_68 = arith.constant 0 : index
    %123 = vector.load %arg17[%122, %c0_68] : memref<8x64xf32, #tpu.memory_space<vmem>>, vector<1x64xf32>
    %124 = vector.broadcast %123 : vector<1x64xf32> to vector<16x64xf32>
    %125 = arith.mulf %124, %75 : vector<16x64xf32>
    %126 = math.exp %125 : vector<16x64xf32>
    %127 = arith.mulf %126, %116 : vector<16x64xf32>
    %128 = arith.index_cast %c3_i32 : i32 to index
    %c0_69 = arith.constant 0 : index
    %c0_70 = arith.constant 0 : index
    %129 = vector.load %arg18[%128, %c0_69, %c0_70] : memref<8x16x64xf32, #tpu.memory_space<vmem>>, vector<1x16x64xf32>
    %130 = vector.shape_cast %129 : vector<1x16x64xf32> to vector<16x64xf32>
    %131 = arith.addf %127, %130 : vector<16x64xf32>
    %132 = arith.index_cast %c3_i32 : i32 to index
    %c0_71 = arith.constant 0 : index
    %133 = vector.load %arg19[%132, %c0_71] : memref<8x16xf32, #tpu.memory_space<vmem>>, vector<1x16xf32>
    %cst_72 = arith.constant dense<0.000000e+00> : vector<1x64xf32>
    %134 = tpu.matmul %133, %131, %cst_72 {dimension_numbers = #tpu.dot_dimension_numbers<[1], [0], [0], [1], [0, 0, 1, 1], [], []>} : vector<1x16xf32>, vector<16x64xf32>, vector<1x64xf32> -> vector<1x64xf32>
    %135 = arith.index_cast %c3_i32 : i32 to index
    %c0_73 = arith.constant 0 : index
    %136 = vector.load %arg20[%135, %c0_73] : memref<8x64xf32, #tpu.memory_space<vmem>>, vector<1x64xf32>
    tpu.vector_store %arg20[%135, %c0_73], %134 {strides = array<i32>} : memref<8x64xf32, #tpu.memory_space<vmem>>, vector<1x64xf32>,
    %c4_i32 = arith.constant 4 : i32
    %137 = arith.index_cast %c4_i32 : i32 to index
    %c0_74 = arith.constant 0 : index
    %138 = vector.load %arg17[%137, %c0_74] : memref<8x64xf32, #tpu.memory_space<vmem>>, vector<1x64xf32>
    %139 = vector.broadcast %138 : vector<1x64xf32> to vector<16x64xf32>
    %140 = arith.mulf %139, %75 : vector<16x64xf32>
    %141 = math.exp %140 : vector<16x64xf32>
    %142 = arith.mulf %141, %131 : vector<16x64xf32>
    %143 = arith.index_cast %c4_i32 : i32 to index
    %c0_75 = arith.constant 0 : index
    %c0_76 = arith.constant 0 : index
    %144 = vector.load %arg18[%143, %c0_75, %c0_76] : memref<8x16x64xf32, #tpu.memory_space<vmem>>, vector<1x16x64xf32>
    %145 = vector.shape_cast %144 : vector<1x16x64xf32> to vector<16x64xf32>
    %146 = arith.addf %142, %145 : vector<16x64xf32>
    %147 = arith.index_cast %c4_i32 : i32 to index
    %c0_77 = arith.constant 0 : index
    %148 = vector.load %arg19[%147, %c0_77] : memref<8x16xf32, #tpu.memory_space<vmem>>, vector<1x16xf32>
    %cst_78 = arith.constant dense<0.000000e+00> : vector<1x64xf32>
    %149 = tpu.matmul %148, %146, %cst_78 {dimension_numbers = #tpu.dot_dimension_numbers<[1], [0], [0], [1], [0, 0, 1, 1], [], []>} : vector<1x16xf32>, vector<16x64xf32>, vector<1x64xf32> -> vector<1x64xf32>
    %150 = arith.index_cast %c4_i32 : i32 to index
    %c0_79 = arith.constant 0 : index
    %151 = vector.load %arg20[%150, %c0_79] : memref<8x64xf32, #tpu.memory_space<vmem>>, vector<1x64xf32>
    tpu.vector_store %arg20[%150, %c0_79], %149 {strides = array<i32>} : memref<8x64xf32, #tpu.memory_space<vmem>>, vector<1x64xf32>,
    %c5_i32 = arith.constant 5 : i32
    %152 = arith.index_cast %c5_i32 : i32 to index
    %c0_80 = arith.constant 0 : index
    %153 = vector.load %arg17[%152, %c0_80] : memref<8x64xf32, #tpu.memory_space<vmem>>, vector<1x64xf32>
    %154 = vector.broadcast %153 : vector<1x64xf32> to vector<16x64xf32>
    %155 = arith.mulf %154, %75 : vector<16x64xf32>
    %156 = math.exp %155 : vector<16x64xf32>
    %157 = arith.mulf %156, %146 : vector<16x64xf32>
    %158 = arith.index_cast %c5_i32 : i32 to index
    %c0_81 = arith.constant 0 : index
    %c0_82 = arith.constant 0 : index
    %159 = vector.load %arg18[%158, %c0_81, %c0_82] : memref<8x16x64xf32, #tpu.memory_space<vmem>>, vector<1x16x64xf32>
    %160 = vector.shape_cast %159 : vector<1x16x64xf32> to vector<16x64xf32>
    %161 = arith.addf %157, %160 : vector<16x64xf32>
    %162 = arith.index_cast %c5_i32 : i32 to index
    %c0_83 = arith.constant 0 : index
    %163 = vector.load %arg19[%162, %c0_83] : memref<8x16xf32, #tpu.memory_space<vmem>>, vector<1x16xf32>
    %cst_84 = arith.constant dense<0.000000e+00> : vector<1x64xf32>
    %164 = tpu.matmul %163, %161, %cst_84 {dimension_numbers = #tpu.dot_dimension_numbers<[1], [0], [0], [1], [0, 0, 1, 1], [], []>} : vector<1x16xf32>, vector<16x64xf32>, vector<1x64xf32> -> vector<1x64xf32>
    %165 = arith.index_cast %c5_i32 : i32 to index
    %c0_85 = arith.constant 0 : index
    %166 = vector.load %arg20[%165, %c0_85] : memref<8x64xf32, #tpu.memory_space<vmem>>, vector<1x64xf32>
    tpu.vector_store %arg20[%165, %c0_85], %164 {strides = array<i32>} : memref<8x64xf32, #tpu.memory_space<vmem>>, vector<1x64xf32>,
    %c6_i32 = arith.constant 6 : i32
    %167 = arith.index_cast %c6_i32 : i32 to index
    %c0_86 = arith.constant 0 : index
    %168 = vector.load %arg17[%167, %c0_86] : memref<8x64xf32, #tpu.memory_space<vmem>>, vector<1x64xf32>
    %169 = vector.broadcast %168 : vector<1x64xf32> to vector<16x64xf32>
    %170 = arith.mulf %169, %75 : vector<16x64xf32>
    %171 = math.exp %170 : vector<16x64xf32>
    %172 = arith.mulf %171, %161 : vector<16x64xf32>
    %173 = arith.index_cast %c6_i32 : i32 to index
    %c0_87 = arith.constant 0 : index
    %c0_88 = arith.constant 0 : index
    %174 = vector.load %arg18[%173, %c0_87, %c0_88] : memref<8x16x64xf32, #tpu.memory_space<vmem>>, vector<1x16x64xf32>
    %175 = vector.shape_cast %174 : vector<1x16x64xf32> to vector<16x64xf32>
    %176 = arith.addf %172, %175 : vector<16x64xf32>
    %177 = arith.index_cast %c6_i32 : i32 to index
    %c0_89 = arith.constant 0 : index
    %178 = vector.load %arg19[%177, %c0_89] : memref<8x16xf32, #tpu.memory_space<vmem>>, vector<1x16xf32>
    %cst_90 = arith.constant dense<0.000000e+00> : vector<1x64xf32>
    %179 = tpu.matmul %178, %176, %cst_90 {dimension_numbers = #tpu.dot_dimension_numbers<[1], [0], [0], [1], [0, 0, 1, 1], [], []>} : vector<1x16xf32>, vector<16x64xf32>, vector<1x64xf32> -> vector<1x64xf32>
    %180 = arith.index_cast %c6_i32 : i32 to index
    %c0_91 = arith.constant 0 : index
    %181 = vector.load %arg20[%180, %c0_91] : memref<8x64xf32, #tpu.memory_space<vmem>>, vector<1x64xf32>
    tpu.vector_store %arg20[%180, %c0_91], %179 {strides = array<i32>} : memref<8x64xf32, #tpu.memory_space<vmem>>, vector<1x64xf32>,
    %c7_i32 = arith.constant 7 : i32
    %182 = arith.index_cast %c7_i32 : i32 to index
    %c0_92 = arith.constant 0 : index
    %183 = vector.load %arg17[%182, %c0_92] : memref<8x64xf32, #tpu.memory_space<vmem>>, vector<1x64xf32>
    %184 = vector.broadcast %183 : vector<1x64xf32> to vector<16x64xf32>
    %185 = arith.mulf %184, %75 : vector<16x64xf32>
    %186 = math.exp %185 : vector<16x64xf32>
    %187 = arith.mulf %186, %176 : vector<16x64xf32>
    %188 = arith.index_cast %c7_i32 : i32 to index
    %c0_93 = arith.constant 0 : index
    %c0_94 = arith.constant 0 : index
    %189 = vector.load %arg18[%188, %c0_93, %c0_94] : memref<8x16x64xf32, #tpu.memory_space<vmem>>, vector<1x16x64xf32>
    %190 = vector.shape_cast %189 : vector<1x16x64xf32> to vector<16x64xf32>
    %191 = arith.addf %187, %190 : vector<16x64xf32>
    %192 = arith.index_cast %c7_i32 : i32 to index
    %c0_95 = arith.constant 0 : index
    %193 = vector.load %arg19[%192, %c0_95] : memref<8x16xf32, #tpu.memory_space<vmem>>, vector<1x16xf32>
    %cst_96 = arith.constant dense<0.000000e+00> : vector<1x64xf32>
    %194 = tpu.matmul %193, %191, %cst_96 {dimension_numbers = #tpu.dot_dimension_numbers<[1], [0], [0], [1], [0, 0, 1, 1], [], []>} : vector<1x16xf32>, vector<16x64xf32>, vector<1x64xf32> -> vector<1x64xf32>
    %195 = arith.index_cast %c7_i32 : i32 to index
    %c0_97 = arith.constant 0 : index
    %196 = vector.load %arg20[%195, %c0_97] : memref<8x64xf32, #tpu.memory_space<vmem>>, vector<1x64xf32>
    tpu.vector_store %arg20[%195, %c0_97], %194 {strides = array<i32>} : memref<8x64xf32, #tpu.memory_space<vmem>>, vector<1x64xf32>,
    %c8_i32 = arith.constant 8 : i32
    %c0_98 = arith.constant 0 : index
    %c0_99 = arith.constant 0 : index
    %197 = vector.load %arg21[%c0_98, %c0_99] : memref<16x64xf32, #tpu.memory_space<vmem>>, vector<16x64xf32>
    tpu.vector_store %arg21[%c0_98, %c0_99], %191 {strides = array<i32>} : memref<16x64xf32, #tpu.memory_space<vmem>>, vector<16x64xf32>,
    %c0_100 = arith.constant 0 : index
    %c0_101 = arith.constant 0 : index
    %198 = vector.load %arg20[%c0_100, %c0_101] : memref<8x64xf32, #tpu.memory_space<vmem>>, vector<8x64xf32>
    %c0_102 = arith.constant 0 : index
    %c0_103 = arith.constant 0 : index
    %199 = vector.load %arg13[%c0_102, %c0_103] : memref<1x64xf32, #tpu.memory_space<vmem>>, vector<1x64xf32>
    %200 = vector.broadcast %199 : vector<1x64xf32> to vector<8x64xf32>
    %201 = arith.mulf %200, %38 : vector<8x64xf32>
    %202 = arith.addf %198, %201 : vector<8x64xf32>
    %203 = arith.negf %8 : vector<8x64xf32>
    %204 = math.exp %203 : vector<8x64xf32>
    %cst_104 = arith.constant 1.000000e+00 : f32
    %205 = vector.broadcast %cst_104 : f32 to vector<8x64xf32>
    %206 = arith.addf %205, %204 : vector<8x64xf32>
    %207 = arith.divf %205, %206 : vector<8x64xf32>
    %208 = arith.mulf %8, %207 : vector<8x64xf32>
    %209 = arith.mulf %202, %208 : vector<8x64xf32>
    %c0_105 = arith.constant 0 : index
    %c0_106 = arith.constant 0 : index
    %210 = vector.load %arg14[%c0_105, %c0_106] : memref<64x32xf32, #tpu.memory_space<vmem>>, vector<64x32xf32>
    %cst_107 = arith.constant dense<0.000000e+00> : vector<8x32xf32>
    %211 = tpu.matmul %209, %210, %cst_107 {dimension_numbers = #tpu.dot_dimension_numbers<[1], [0], [0], [1], [0, 0, 1, 1], [], []>} : vector<8x64xf32>, vector<64x32xf32>, vector<8x32xf32> -> vector<8x32xf32>
    %212 = vector.shape_cast %211 : vector<8x32xf32> to vector<1x8x32xf32>
    %c0_108 = arith.constant 0 : index
    %c0_109 = arith.constant 0 : index
    %c0_110 = arith.constant 0 : index
    %213 = vector.load %arg15[%c0_108, %c0_109, %c0_110] : memref<1x8x32xf32, #tpu.memory_space<vmem>>, vector<1x8x32xf32>
    tpu.vector_store %arg15[%c0_108, %c0_109, %c0_110], %212 {strides = array<i32>} : memref<1x8x32xf32, #tpu.memory_space<vmem>>, vector<1x8x32xf32>,
    return
  }
  func.func @transform_0(%arg0: i32, %arg1: i32) -> (i32, i32, i32) {
    %c0_i32 = arith.constant 0 : i32
    %c0_i32_0 = arith.constant 0 : i32
    return %arg0, %arg1, %c0_i32 : i32, i32, i32
  }
  func.func @transform_1(%arg0: i32, %arg1: i32) -> (i32, i32) {
    %c0_i32 = arith.constant 0 : i32
    %c0_i32_0 = arith.constant 0 : i32
    %c0_i32_1 = arith.constant 0 : i32
    return %c0_i32, %c0_i32_0 : i32, i32
  }
  func.func @transform_2(%arg0: i32, %arg1: i32) -> (i32, i32) {
    %c0_i32 = arith.constant 0 : i32
    %c0_i32_0 = arith.constant 0 : i32
    %c0_i32_1 = arith.constant 0 : i32
    return %c0_i32, %c0_i32_0 : i32, i32
  }
  func.func @transform_3(%arg0: i32, %arg1: i32) -> (i32, i32) {
    %c0_i32 = arith.constant 0 : i32
    %c0_i32_0 = arith.constant 0 : i32
    %c0_i32_1 = arith.constant 0 : i32
    return %c0_i32, %c0_i32_0 : i32, i32
  }
  func.func @transform_4(%arg0: i32, %arg1: i32) -> (i32, i32) {
    %c0_i32 = arith.constant 0 : i32
    %c0_i32_0 = arith.constant 0 : i32
    %c0_i32_1 = arith.constant 0 : i32
    return %c0_i32, %c0_i32_0 : i32, i32
  }
  func.func @transform_5(%arg0: i32, %arg1: i32) -> (i32, i32) {
    %c0_i32 = arith.constant 0 : i32
    %c0_i32_0 = arith.constant 0 : i32
    %c0_i32_1 = arith.constant 0 : i32
    return %c0_i32, %c0_i32_0 : i32, i32
  }
  func.func @transform_6(%arg0: i32, %arg1: i32) -> (i32, i32) {
    %c0_i32 = arith.constant 0 : i32
    %c0_i32_0 = arith.constant 0 : i32
    %c0_i32_1 = arith.constant 0 : i32
    return %c0_i32, %c0_i32_0 : i32, i32
  }
  func.func @transform_7(%arg0: i32, %arg1: i32) -> (i32, i32) {
    %c0_i32 = arith.constant 0 : i32
    %c0_i32_0 = arith.constant 0 : i32
    %c0_i32_1 = arith.constant 0 : i32
    return %c0_i32, %c0_i32_0 : i32, i32
  }
  func.func @transform_8(%arg0: i32, %arg1: i32) -> (i32, i32) {
    %c0_i32 = arith.constant 0 : i32
    %c0_i32_0 = arith.constant 0 : i32
    %c0_i32_1 = arith.constant 0 : i32
    return %c0_i32, %c0_i32_0 : i32, i32
  }
  func.func @transform_9(%arg0: i32, %arg1: i32) -> (i32, i32) {
    %c0_i32 = arith.constant 0 : i32
    %c0_i32_0 = arith.constant 0 : i32
    %c0_i32_1 = arith.constant 0 : i32
    return %c0_i32, %c0_i32_0 : i32, i32
  }
  func.func @transform_10(%arg0: i32, %arg1: i32) -> (i32, i32) {
    %c0_i32 = arith.constant 0 : i32
    %c0_i32_0 = arith.constant 0 : i32
    %c0_i32_1 = arith.constant 0 : i32
    return %c0_i32, %c0_i32_0 : i32, i32
  }
  func.func @transform_11(%arg0: i32, %arg1: i32) -> (i32, i32) {
    %c0_i32 = arith.constant 0 : i32
    %c0_i32_0 = arith.constant 0 : i32
    %c0_i32_1 = arith.constant 0 : i32
    return %c0_i32, %c0_i32_0 : i32, i32
  }
  func.func @transform_12(%arg0: i32, %arg1: i32) -> (i32, i32) {
    %c0_i32 = arith.constant 0 : i32
    %c0_i32_0 = arith.constant 0 : i32
    %c0_i32_1 = arith.constant 0 : i32
    return %c0_i32, %c0_i32_0 : i32, i32
  }
  func.func @transform_13(%arg0: i32, %arg1: i32) -> (i32, i32, i32) {
    %c0_i32 = arith.constant 0 : i32
    %c0_i32_0 = arith.constant 0 : i32
    return %arg0, %arg1, %c0_i32 : i32, i32, i32
  }
}

</mosaic_0001>

<bundles_post_ra>
// kernel: tpu_custom_call.1
= control target key start
LH: loop header
LB: loop body
LE: loop exit
PB: predicated region body
PF: predicated region fallthrough
CT: control target
= control target key end

     0   :  { %s3204_s0 = inlined_call_operand.vmem [shape: f32[2,8,32], index: 0, kind: input, shape index: {}]   ;;  %s3205_s1 = inlined_call_operand.vmem [shape: f32[32,64], index: 1, kind: input, shape index: {}]   ;;  %s3206_s2 = inlined_call_operand.vmem [shape: f32[32,64], index: 2, kind: input, shape index: {}]   ;;  %s3207_s3 = inlined_call_operand.vmem [shape: f32[4,64], index: 3, kind: input, shape index: {}]   ;;  %s3208_s4 = inlined_call_operand.vmem [shape: f32[1,64], index: 4, kind: input, shape index: {}]   ;;  %s3209_s5 = inlined_call_operand.vmem [shape: f32[64,2], index: 5, kind: input, shape index: {}]   ;;  %s3210_s6 = inlined_call_operand.vmem [shape: f32[64,16], index: 6, kind: input, shape index: {}]   ;;  %s3211_s7 = inlined_call_operand.vmem [shape: f32[64,16], index: 7, kind: input, shape index: {}]   ;;  %s3212_s8 = inlined_call_operand.vmem [shape: f32[2,64], index: 8, kind: input, shape index: {}]   ;;  %s3213_s9 = inlined_call_operand.vmem [shape: f32[1,64], index: 9, kind: input, shape index: {}]   ;;  %s3214_s10 = inlined_call_operand.vmem [shape: f32[16,64], index: 10, kind: input, shape index: {}]   ;;  %s3215_s11 = inlined_call_operand.vmem [shape: f32[1,64], index: 11, kind: input, shape index: {}]   ;;  %s3216_s12 = inlined_call_operand.vmem [shape: f32[64,32], index: 12, kind: input, shape index: {}]   ;;  %s3217_s13 = inlined_call_operand.hbm [shape: f32[2,8,32], index: 13, kind: output, shape index: {}]  }
   0x1   :  { %3219 = sst [smem:[#allocation12_spill]] %s3204_s0 }
   0x2   :  { %3220 = sst [smem:[#allocation13_spill]] %s3205_s1 }
   0x3   :  { %3221 = sst [smem:[#allocation14_spill]] %s3206_s2 }
   0x4   :  { %18 = vsyncpa [#allocation9], 0 }
   0x5   :  { %20 = vsyncpa [#allocation9 + $0x1], 0  ;;  %s2775_s25 = smov 0   ;;  %s2777_s26 = smov 0  }
   0x6   :  { %s2779_s27 = smov 0   ;;  %s2781_s28 = smov 0  }
   0x7   :  { %s2783_s29 = smov 0   ;;  %s2785_s30 = smov 0  }
   0x8 LB: > { %s2162_s14 = sadd.s32 4294967295, %s2698_s30   ;;  %s2163_s15 = sadd.s32 4294967294, %s2698_s30   ;;  %s2698_s30 = sphi %s2785_s30, %s26_s30   ;;  %s2694_s29 = sphi %s2783_s29, %s3233_s29   ;;  %s2690_s28 = sphi %s2781_s28, %s3232_s28   ;;  %s2686_s27 = sphi %s2779_s27, %s3231_s27   ;;  %s2682_s26 = sphi %s2777_s26, %s3230_s26   ;;  %s2678_s25 = sphi %s2775_s25, %s3229_s25  }
   0x9   : > { %s38_s16 = sadd.s32 1, %s2694_s29  ;;  %s327_s17 = sadd.s32 1, %s2686_s27 }
   0xa   : > { %p40_p0 = scmp.ge.s32.totalorder %s38_s16, 2  ;;  %p337_p1 = scmp.ne.s32.totalorder %s2686_s27, %s2682_s26 }
   0xb   : > { %p338_p2 = scmp.eq.s32.totalorder %s2162_s14, 1  ;;  %p343_p3 = scmp.ne.s32.totalorder %s2682_s26, %s2678_s25 }
   0xc   : > { %s3235_s16 = smov (%p40_p0, %s38_s16), 0  ;;  %p344_p5 = scmp.eq.s32.totalorder %s2163_s15, 1 }
   0xd   : > { %3222 = sst [smem:[#allocation11_spill]] %s3235_s16  ;;  %p2815_p4 = por %p338_p2, %p337_p1 }
   0xe   : > { %s322_s19 = ssub.s32 %s2694_s29, %s3235_s16  ;;  %p2166_p6 = scmp.ge.s32.totalorder %s2698_s30, 1 }
   0xf   : > { %p325_p7 = scmp.eq.s32.totalorder %s322_s19, 0  ;;  %p2822_p8 = por %p344_p5, %p343_p3 }
  0x10   : > { %p408_p9 = scmp.lt.s32.totalorder %s2698_s30, 3 }
  0x11   : > { %s2828_s21 = scalar_select %p325_p7, %s2686_s27, %s327_s17  }
  0x12   : > { %p409_p10 = pnand %p2166_p6, %p408_p9 }
  0x13   : > { %s3225_s1 = sld [smem:[#allocation13_spill]] (!%p409_p10)  ;;  %v2700_v3 = vmov (!%p409_p10), 0.0|0.0   ;;  %vm2701_vm0 = vmmov (!%p409_p10), 0   ;;  %v2702_v6 = vmov (!%p409_p10), 0.0   ;;  %p454_p11 = scmp.lt.s32.totalorder (!%p409_p10), %s2690_s28, 1  ;;  %vm465_vm1 = vcmask (!%p409_p10), 523264  }
  0x14   : > { %412 = sbr.rel (%p409_p10) target bundleno = 1274 (0x4fa), region = 72  ;;  %2433 = vmatprep.subr.bf16.mxu0 (!%p409_p10), %v2700_v3  ;;  %2282 = vmatprep.mubr.msk.f32.mxu0 (!%p409_p10), %vm2701_vm0, %v2702_v6  ;;  %466 = vst.msk [vmem:[#allocation7] sm:$0xff] (!%p409_p10), %vm465_vm1, %v2702_v6  ;;  %467 = vst.msk [vmem:[#allocation7 + $0x8] sm:$0xff] (!%p409_p10), %vm465_vm1, %v2702_v6  ;;  %s3226_s2 = sld [smem:[#allocation14_spill]] (!%p409_p10)  ;;  %vm475_vm2 = vcmask (!%p409_p10), 261120   ;;  %vm468_vm3 = vcmask (!%p409_p10), 518144   ;;  %v627_v39 = vlaneseq (!%p409_p10) }
  0x15   : > { %2457 = vmatprep.subr.bf16.mxu1 (!%p409_p10), %v2700_v3  ;;  %2331 = vmatprep.mubr.msk.f32.mxu1 (!%p409_p10), %vm2701_vm0, %v2702_v6  ;;  %s3227_s0 = sld [smem:[#allocation12_spill]] (!%p409_p10)  ;;  %469 = vst.msk [vmem:[#allocation2 + $0x5] sm:$0x7] (!%p409_p10), %vm468_vm3, %v2702_v6  ;;  %v671_v15 = vld [vmem:[%s3209_s5] sm:$0xff] (!%p409_p10)  ;;  %v672_v16 = vld [vmem:[%s3209_s5 + $0x8] sm:$0xff] (!%p409_p10)  ;;  %v673_v20 = vld [vmem:[%s3209_s5 + $0x10] sm:$0xff] (!%p409_p10) }
  0x16   : > { %v752_v17 = vld [vmem:[%s3210_s6] sm:$0xff] (!%p409_p10)  ;;  %v2446_v18 = vpack.c.bf16 (!%p409_p10), %v672_v16, %v671_v15  ;;  %v753_v19 = vld [vmem:[%s3210_s6 + $0x8] sm:$0xff] (!%p409_p10)  ;;  %v674_v21 = vld [vmem:[%s3209_s5 + $0x18] sm:$0xff] (!%p409_p10)  ;;  %v2937_v40 = vshrl.u32 (!%p409_p10), %v627_v39, 7  ;;  %vm920_vm4 = vcmask (!%p409_p10), 1041408   ;;  %vm916_vm5 = vcmask (!%p409_p10), 15360  }
  0x17   : > { %v2458_v22 = vpack.c.bf16 (!%p409_p10), %v753_v19, %v752_v17  ;;  %v754_v23 = vld [vmem:[%s3210_s6 + $0x10] sm:$0xff] (!%p409_p10)  ;;  %v755_v24 = vld [vmem:[%s3210_s6 + $0x18] sm:$0xff] (!%p409_p10)  ;;  %v2449_v25 = vpack.c.bf16 (!%p409_p10), %v674_v21, %v673_v20  ;;  %v675_v27 = vld [vmem:[%s3209_s5 + $0x20] sm:$0xff] (!%p409_p10)  ;;  %vm1013_vm6 = vcmask (!%p409_p10), 130048   ;;  %vm1321_vm9 = vcmask (!%p409_p10), 516096   ;;  %s451_s14 = sand.u32 (!%p409_p10), 1, %s2682_s26  }
  0x18   : > { %v2461_v26 = vpack.c.bf16 (!%p409_p10), %v755_v24, %v754_v23  ;;  %v676_v28 = vld [vmem:[%s3209_s5 + $0x28] sm:$0xff] (!%p409_p10)  ;;  %v756_v29 = vld [vmem:[%s3210_s6 + $0x20] sm:$0xff] (!%p409_p10)  ;;  %v677_v33 = vld [vmem:[%s3209_s5 + $0x30] sm:$0xff] (!%p409_p10)  ;;  %v2941_v43 = vsub.s32 (!%p409_p10), 0, %v2937_v40  ;;  %v635_v44 = vsub.s32 (!%p409_p10), 1, %v2937_v40  ;;  %v642_v46 = vsub.s32 (!%p409_p10), 2, %v2937_v40 }
  0x19   : > { %v471_v0 = vld [vmem:[%s3225_s1] sm:$0xff] (!%p409_p10)  ;;  %v472_v1 = vld [vmem:[%s3225_s1 + $0x8] sm:$0xff] (!%p409_p10)  ;;  %v473_v2 = vld [vmem:[%s3225_s1 + $0x10] sm:$0xff] (!%p409_p10)  ;;  %2459 = vmatpush3.bf16.msra.mxu1 (!%p409_p10), %v2458_v22  ;;  %v2452_v31 = vpack.c.bf16 (!%p409_p10), %v676_v28, %v675_v27  ;;  %v649_v49 = vsub.s32 (!%p409_p10), 3, %v2937_v40  ;;  %s2199_s19 = sshll.u32 (!%p409_p10), %s2690_s28, 7  ;;  %s2077_s23 = scalar_lea.sflag (!%p409_p10), [#allocation9], %s451_s14 }
  0x1a   : > { %v2434_v4 = vpack.c.bf16 (!%p409_p10), %v472_v1, %v471_v0  ;;  %v474_v5 = vld [vmem:[%s3225_s1 + $0x18] sm:$0xff] (!%p409_p10)  ;;  %v549_v8 = vld [vmem:[%s3226_s2] sm:$0xff] (!%p409_p10)  ;;  %v550_v9 = vld [vmem:[%s3226_s2 + $0x8] sm:$0xff] (!%p409_p10)  ;;  %2460 = vmatprep.subr.bf16.mxu1 (!%p409_p10), %v2700_v3 }
  0x1b   : > { %v2437_v7 = vpack.c.bf16 %v474_v5, %v473_v2  ;;  %s455_s16 = scalar_select %p454_p11, %s2690_s28, 1  ;;  %v2440_v11 = vpack.c.bf16 %v550_v9, %v549_v8  ;;  %v551_v12 = vld [vmem:[%s3226_s2 + $0x10] sm:$0xff]  ;;  %v552_v13 = vld [vmem:[%s3226_s2 + $0x18] sm:$0xff]  ;;  %v757_v30 = vld [vmem:[%s3210_s6 + $0x28] sm:$0xff] }
  0x1c   : > { %2435 = vmatpush3.bf16.msra.mxu0 %v2434_v4  ;;  %v2443_v14 = vpack.c.bf16 %v552_v13, %v551_v12  ;;  %v2464_v32 = vpack.c.bf16 %v757_v30, %v756_v29  ;;  %v678_v34 = vld [vmem:[%s3209_s5 + $0x38] sm:$0xff]  ;;  %v758_v35 = vld [vmem:[%s3210_s6 + $0x30] sm:$0xff]  ;;  %v625_v45 = vld [vmem:[%s3207_s3] sm:$0xf]  ;;  %s2704_s28 = smov [#allocation8]  }
  0x1d   : > { %2436 = vmatprep.subr.bf16.mxu0 %v2700_v3  ;;  %s2168_s15 = sshll.u32 %s455_s16, 3  ;;  %2462 = vmatpush3.bf16.msra.mxu1 %v2461_v26  ;;  %v759_v36 = vld [vmem:[%s3210_s6 + $0x38] sm:$0xff]  ;;  %v2455_v37 = vpack.c.bf16 %v678_v34, %v677_v33  ;;  %v630_v47 = vrot.slane %v625_v45, %v2941_v43  ;;  %v636_v48 = vrot.slane %v625_v45, %v635_v44  ;;  %v2171_v63 = vld [vmem:[%s3208_s4] ss:$0 sm:$0xff]  ;;  %v831_v8 = vld [vmem:[%s3211_s7 + $0x8] sm:$0xff]  ;;  %s3156_s16 = scalar_lea.hbm %s3217_s13, %s2199_s19 }
  0x1e   : > { %s460_s1 = scalar_lea.vmem %s3227_s0, %s2168_s15  ;;  %2463 = vmatprep.subr.bf16.mxu1 %v2700_v3  ;;  %v2467_v38 = vpack.c.bf16 %v759_v36, %v758_v35  ;;  %v643_v50 = vrot.slane %v625_v45, %v642_v46  ;;  %v650_v57 = vrot.slane %v625_v45, %v649_v49  ;;  %v832_v12 = vld [vmem:[%s3211_s7 + $0x10] sm:$0xff]  ;;  %v833_v13 = vld [vmem:[%s3211_s7 + $0x18] sm:$0xff]  ;;  %v834_v16 = vld [vmem:[%s3211_s7 + $0x20] sm:$0xff]  ;;  %v1123_v36 = vsub.s32 5, %v2937_v40  ;;  %s2167_s15 = sshll.u32 %s451_s14, 3 }
  0x1f   : > { %v470_v10 = vld [vmem:[%s460_s1] sm:$0xff]  ;;  %v2473_v15 = vpack.c.bf16 %v833_v13, %v832_v12  ;;  %v835_v17 = vld [vmem:[%s3211_s7 + $0x28] sm:$0xff]  ;;  %v836_v19 = vld [vmem:[%s3211_s7 + $0x30] sm:$0xff]  ;;  %s453_s17 = scalar_lea.vmem [#allocation8], %s2167_s15  ;;  %s2624_s1 = sshll.u32 %s2704_s28, 4  ;;  %s2625_s1 = int_to_ptr.vmem [resolvable:$false] %s2624_s1 }
  0x20   : > { %2438 = vmatpush3.bf16.msra.mxu0 %v2437_v7  ;;  %v830_v7 = vld [vmem:[%s3211_s7] sm:$0xff]  ;;  %v837_v20 = vld [vmem:[%s3211_s7 + $0x38] sm:$0xff]  ;;  %s2091_s0 = sshll.u32 %s453_s17, 4  ;;  %s2626_s15 = scalar_lea.vmem %s2625_s1, 256  ;;  %s3158_s0 = int_to_ptr.vmem [resolvable:$true] %s2091_s0 }
  0x21   : > { %2439 = vmatprep.subr.bf16.mxu0 %v2700_v3  ;;  %2465 = vmatpush3.bf16.msra.mxu1 %v2464_v32  ;;  %v2479_v21 = vpack.c.bf16 %v837_v20, %v836_v19  ;;  %v1112_v32 = vsub.s32 4, %v2937_v40  ;;  %s2620_s24 = scalar_lea.vmem %s3158_s0, 128  ;;  %p2627_p1 = scmp.lt.s32.totalorder %s3158_s0, %s2625_s1 }
  0x22   : > { %2466 = vmatprep.subr.bf16.mxu1 %v2700_v3  ;;  %p2621_p12 = scmp.ne.s32.totalorder %s3158_s0, %s2620_s24  ;;  %p2628_p2 = scmp.lt.s32.totalorder %s2626_s15, %s2620_s24 }
  0x23   : > { %2283 = vmatmul.mubr.msk.f32.vlgmr.msra.gmra.mrb[0].mxu0 %vm475_vm2, %v470_v10 }
  0x24   : > { %2441 = vmatpush3.bf16.msra.mxu0 %v2440_v11  ;;  %2293 = vmatprep.mubr.msk.f32.mxu0 %vm2701_vm0, %v2702_v6  ;;  %p2622_p13 = pnand %p2621_p12, %p2815_p4  ;;  %p2629_p3 = por %p2628_p2, %p2627_p1 }
  0x25   : > { %2442 = vmatprep.subr.bf16.mxu0 %v2700_v3  ;;  %2468 = vmatpush3.bf16.msra.mxu1 %v2467_v38  ;;  %v1134_v38 = vsub.s32 6, %v2937_v40 }
  0x26   : > { %2353 = vmatprep.subr.mxu1 %v2702_v6  ;;  %p2623_p0 = pneg %p2622_p13 }
  0x28   : > { %2444 = vmatpush3.bf16.msra.mxu0 %v2443_v14  ;;  %v908_v14 = vld [vmem:[%s3212_s8] sm:$0x3]  ;;  %p2630_p5 = pnand %p2629_p3, %p2623_p0 }
  0x29   : > { %2445 = vmatprep.subr.bf16.mxu0 %v2700_v3 }
  0x2b   : > { %2294 = vmatmul.mubr.msk.f32.vlgmr.msra.gmra.mrb[2].mxu0 %vm475_vm2, %v470_v10  ;;  %v2470_v10 = vpack.c.bf16 %v831_v8, %v830_v7 }
  0x2c   : > { %2312 = vmatprep.mubr.msk.f32.mxu0 %vm2701_vm0, %v2702_v6  ;;  %2447 = vmatpush3.bf16.msra.mxu0 %v2446_v18  ;;  %v2476_v18 = vpack.c.bf16 %v835_v17, %v834_v16 }
  0x2d   : > { %2448 = vmatprep.subr.bf16.mxu0 %v2700_v3 }
  0x30   : > { %2450 = vmatpush3.bf16.msra.mxu0 %v2449_v25 }
  0x31   : > { %2451 = vmatprep.subr.bf16.mxu0 %v2700_v3 }
  0x34   : > { %2453 = vmatpush3.bf16.msra.mxu0 %v2452_v31 }
  0x35   : > { %2454 = vmatprep.subr.bf16.mxu0 %v2700_v3 }
  0x38   : > { %2456 = vmatpush3.bf16.msra.mxu0 %v2455_v37 }
  0x39   : > { %2469 = vmatprep.subr.bf16.mxu0 %v2700_v3 }
  0xf6   : > { %v545_v41 = vpop.f32.mrb[0].mxu0 }
  0xf7   : > { %624 = vst.msk [vmem:[#allocation2 + $0x8] sm:$0xff] %vm465_vm1, %v545_v41  ;;  %v2284_v42 = vpop.f32.mrb[1].mxu0  ;;  %v1145_v41 = vsub.s32 7, %v2937_v40 }
  0xfe   : > { %v668_v51 = vld [vmem:[#allocation2 + $0xd] sm:$0x7]  ;;  %v626_v52 = vld [vmem:[#allocation2 + $0x5] sm:$0xff]  ;;  %v3006_v22 = vpop.f32.mrb[2].mxu0 }
  0xff   : > { %v632_v53 = vld [vmem:[#allocation2 + $0x6] sm:$0xff]  ;;  %v631_v54 = vmul.f32 %v630_v47, %v626_v52  ;;  %v2295_v23 = vpop.f32.mrb[3].mxu0 }
 0x100   : > { %v637_v55 = vmul.f32 %v636_v48, %v632_v53  ;;  %v639_v56 = vld [vmem:[#allocation2 + $0x7] sm:$0xff] }
 0x101   : > { %v646_v58 = vld [vmem:[#allocation2 + $0x8] sm:$0xff]  ;;  %670 = vst.msk [vmem:[#allocation2 + $0x5] sm:$0x7] %vm468_vm3, %v668_v51  ;;  %v644_v60 = vmul.f32 %v643_v50, %v639_v56 }
 0x102   : > { %v638_v59 = vadd.f32 %v637_v55, %v631_v54  ;;  %v651_v62 = vmul.f32 %v650_v57, %v646_v58 }
 0x104   : > { %v645_v61 = vadd.f32 %v644_v60, %v638_v59 }
 0x106   : > { %v652_v0 = vadd.f32 %v651_v62, %v645_v61 }
 0x108   : > { %v660_v1 = vadd.f32 %v2171_v63, %v652_v0  ;;  %v2703_v63 = vmov 1966171168  }
 0x109   : > { %v1019_v0 = vunpack.c.l.s4 %v2703_v63 }
 0x10a   : > { %v2172_v2 = vmul.f32 -1.442695, %v660_v1 }
 0x10b   : > { %v1020_v7 = vunpack.c.0.s8 %v1019_v0 }
 0x10c   : > { %2576 = vpow2.f32 %v2172_v2 }
 0x116   : > { %v2577_v4 = vpop.eup %2576 }
 0x117   : > { %v664_v5 = vadd.f32 1.0, %v2577_v4 }
 0x119   : > { %2578 = vrcp.f32 %v664_v5 }
 0x123   : > { %v2579_v9 = vpop.eup %2578 }
 0x124   : > { %v2966_v11 = vmul.f32 %v2579_v9, %v660_v1 }
 0x126   : > { %2313 = vmatmul.mubr.msk.f32.vlgmr.msra.gmra.mrb[4].mxu0 %vm465_vm1, %v2966_v11  ;;  %2332 = vmatmul.mubr.msk.f32.vlgmr.msra.gmra.mrb[0].mxu1 %vm465_vm1, %v2966_v11 }
 0x127   : > { %2471 = vmatpush3.bf16.msra.mxu0 %v2470_v10  ;;  %2350 = vmatprep.mubr.msk.f32.mxu0 %vm2701_vm0, %v2702_v6 }
 0x128   : > { %2472 = vmatprep.subr.bf16.mxu0 %v2700_v3  ;;  %2354 = vmatpush3.msk.msra.mxu1 %vm920_vm4, %v908_v14  ;;  %v1023_v14 = vsub.s32 %v1020_v7, %v2937_v40 }
 0x129   : > { %2355 = vmatprep.mubr.msk.f32.mxu1 %vm2701_vm0, %v2702_v6  ;;  %2481 = vmatprep.subr.bf16.mxu1 %v2700_v3 }
 0x12b   : > { %2474 = vmatpush3.bf16.msra.mxu0 %v2473_v15 }
 0x12c   : > { %2475 = vmatprep.subr.bf16.mxu0 %v2700_v3 }
 0x12f   : > { %2477 = vmatpush3.bf16.msra.mxu0 %v2476_v18 }
 0x130   : > { %2478 = vmatprep.subr.bf16.mxu0 %v2700_v3 }
 0x133   : > { %2480 = vmatpush3.bf16.msra.mxu0 %v2479_v21 }
 0x134   : > { %2490 = vmatprep.subr.bf16.mxu0 %v2700_v3 }
 0x136   : > { %2351 = vmatmul.mubr.msk.f32.vlgmr.msra.gmra.mrb[6].mxu0 %vm465_vm1, %v2966_v11 }
 0x137   : > { %2383 = vmatprep.mubr.msk.f32.mxu0 %vm2701_vm0, %v2702_v6 }
 0x1f9   : > { %v748_v24 = vpop.f32.mrb[4].mxu0  ;;  %v826_v25 = vpop.f32.mrb[0].mxu1 }
 0x1fa   : > { %v2314_v26 = vpop.f32.mrb[5].mxu0  ;;  %v2333_v27 = vpop.f32.mrb[1].mxu1  ;;  %2356 = vmatmul.mubr.msk.f32.vlgmr.msra.gmra.mrb[2].mxu1 %vm916_vm5, %v748_v24  ;;  %v1080_v28 = vrot.slane %v826_v25, %v635_v44  ;;  %v1069_v29 = vrot.slane %v826_v25, %v2941_v43  ;;  %v1091_v30 = vrot.slane %v826_v25, %v642_v46  ;;  %v1102_v31 = vrot.slane %v826_v25, %v649_v49  ;;  %v2176_v44 = vld [vmem:[%s3213_s9] ss:$0 sm:$0xff] }
 0x1fb   : > { %2362 = vmatprep.mubr.msk.f32.mxu1 %vm2701_vm0, %v2702_v6  ;;  %v1113_v35 = vrot.slane %v826_v25, %v1112_v32  ;;  %v1124_v37 = vrot.slane %v826_v25, %v1123_v36  ;;  %v1135_v39 = vrot.slane %v826_v25, %v1134_v38  ;;  %v1146_v42 = vrot.slane %v826_v25, %v1145_v41 }
 0x1fc   : > { %1082 = vbcast.lane.b32.xlu1 %v1080_v28, 256  ;;  %1071 = vbcast.lane.b32.xlu0 %v1069_v29, 256 }
 0x200   : > { %1086 = vbcast.lane.b32.xlu1 %v1080_v28, 264  ;;  %1075 = vbcast.lane.b32.xlu0 %v1069_v29, 264 }
 0x204   : > { %1097 = vbcast.lane.b32.xlu1 %v1091_v30, 264  ;;  %1093 = vbcast.lane.b32.xlu0 %v1091_v30, 256 }
 0x208   : > { %1108 = vbcast.lane.b32.xlu1 %v1102_v31, 264  ;;  %1104 = vbcast.lane.b32.xlu0 %v1102_v31, 256 }
 0x209   : > { %v904_v33 = vpop.f32.mrb[6].mxu0 }
 0x20a   : > { %1014 = vst.msk [vmem:[#allocation5] sm:$0xff] %vm1013_vm6, %v904_v33  ;;  %v2352_v34 = vpop.f32.mrb[7].mxu0 }
 0x20c   : > { %1119 = vbcast.lane.b32.xlu1 %v1113_v35, 264  ;;  %1115 = vbcast.lane.b32.xlu0 %v1113_v35, 256 }
 0x210   : > { %1130 = vbcast.lane.b32.xlu1 %v1124_v37, 264  ;;  %1126 = vbcast.lane.b32.xlu0 %v1124_v37, 256 }
 0x214   : > { %1141 = vbcast.lane.b32.xlu1 %v1135_v39, 264  ;;  %1137 = vbcast.lane.b32.xlu0 %v1135_v39, 256 }
 0x218   : > { %1152 = vbcast.lane.b32.xlu1 %v1146_v42, 264  ;;  %1148 = vbcast.lane.b32.xlu0 %v1146_v42, 256 }
 0x26e   : > { %v1083_v51 = vpop.permute.xlu1 %1082  ;;  %v1072_v52 = vpop.permute.xlu0 %1071 }
 0x272   : > { %v1087_v53 = vpop.permute.xlu1 %1086  ;;  %v1076_v54 = vpop.permute.xlu0 %1075 }
 0x276   : > { %v1098_v57 = vpop.permute.xlu1 %1097  ;;  %v1094_v58 = vpop.permute.xlu0 %1093 }
 0x27a   : > { %v1109_v60 = vpop.permute.xlu1 %1108  ;;  %v1105_v61 = vpop.permute.xlu0 %1104 }
 0x27e   : > { %v1120_v8 = vpop.permute.xlu1 %1119  ;;  %v1116_v9 = vpop.permute.xlu0 %1115 }
 0x282   : > { %v1131_v17 = vpop.permute.xlu1 %1130  ;;  %v1127_v18 = vpop.permute.xlu0 %1126 }
 0x286   : > { %v1142_v29 = vpop.permute.xlu1 %1141  ;;  %v1138_v30 = vpop.permute.xlu0 %1137 }
 0x2cd   : > { %v990_v45 = vpop.f32.mrb[2].mxu1 }
 0x2ce   : > { %v991_v46 = vadd.f32 %v2176_v44, %v990_v45  ;;  %v2357_v47 = vpop.f32.mrb[3].mxu1 }
 0x2d0   : > { %v997_v48 = vand.u32 2147483647, %v991_v46  ;;  %v994_v10 = vmax.f32 %v991_v46, 0.0  ;;  %vm995_vm8 = vcmp.ne.f32.partialorder %v991_v46, %v991_v46 }
 0x2d2   : > { %v998_v49 = vsub.f32 0.0, %v997_v48 }
 0x2d4   : > { %v999_v50 = vmul.f32 1.442695, %v998_v49  ;;  %v3040_v49 = vld [vmem:[%s3214_s10] sm:$0xff] }
 0x2d6   : > { %2580 = vpow2.f32 %v999_v50 }
 0x2e0   : > { %v2581_v55 = vpop.eup %2580 }
 0x2e1   : > { %v1001_v56 = vadd.f32 1.0, %v2581_v55  ;;  %v1004_v59 = vmul.f32 -0.5, %v2581_v55  ;;  %v1007_v1 = vand.u32 2147483647, %v2581_v55 }
 0x2e3   : > { %2582 = vlog2.f32 %v1001_v56  ;;  %v1005_v62 = vadd.f32 1.0, %v1004_v59  ;;  %vm1008_vm7 = vcmp.lt.f32.partialorder %v1007_v1, 0.0004427343 }
 0x2e5   : > { %v1006_v5 = vmul.f32 %v2581_v55, %v1005_v62 }
 0x2ed   : > { %v2583_v2 = vpop.eup %2582 }
 0x2ee   : > { %v1003_v4 = vmul.f32 0.6931472, %v2583_v2 }
 0x2f0   : > { %v1009_v12 = vsel %vm1008_vm7, %v1006_v5, %v1003_v4 }
 0x2f1   : > { %v1010_v13 = vadd.f32 %v1009_v12, %v994_v10 }
 0x2f3   : > { %v1011_v15 = vsel %vm995_vm8, %v991_v46, %v1010_v13 }
 0x2f4   : > { %1012 = vst.msk [vmem:[#allocation3] sm:$0xff] %vm465_vm1, %v1011_v15  ;;  %v1015_v16 = vmul.f32 %v1011_v15, %v2966_v11 }
 0x2f6   : > { %v1017_v19 = vcombine.high %v1015_v16, %v1015_v16  ;;  %v1024_v20 = vrot.slane %v1015_v16, %v1023_v14 }
 0x2f8   : > { %v1031_v21 = vrot.slane %v1017_v19, %v1023_v14  ;;  %v1032_v23 = vcombine.high %v1024_v20, %v1024_v20  ;;  %v1040_v24 = vrot.slane %v1024_v20, %v1023_v14 }
 0x2fa   : > { %v1033_v25 = vcombine.high %v1031_v21, %v1031_v21  ;;  %v1047_v26 = vrot.slane %v1031_v21, %v1023_v14  ;;  %v1054_v27 = vrot.slane %v1032_v23, %v1023_v14  ;;  %v1062_v28 = vcombine.high %v1040_v24, %v1040_v24  ;;  %v1228_v21 = vld [vmem:[#allocation7] sm:$0xff] }
 0x2fb   : > { %v1157_v40 = vrot.slane %v1040_v24, %v2941_v43  ;;  %v2179_v50 = vld [vmem:[#allocation3] ss:$0 sm:$0xff]  ;;  %v2183_v7 = vld [vmem:[#allocation3 + $0x2] ss:$0 sm:$0xff]  ;;  %v2185_v15 = vld [vmem:[#allocation3 + $0x3] ss:$0 sm:$0xff] }
 0x2fc   : > { %v1061_v31 = vrot.slane %v1033_v25, %v1023_v14  ;;  %v1063_v32 = vcombine.high %v1047_v26, %v1047_v26  ;;  %v1064_v33 = vcombine.high %v1054_v27, %v1054_v27  ;;  %v1161_v34 = vrot.slane %v1054_v27, %v2941_v43  ;;  %v2187_v20 = vld [vmem:[#allocation3 + $0x4] ss:$0 sm:$0xff] }
 0x2fd   : > { %v1165_v35 = vrot.slane %v1062_v28, %v2941_v43  ;;  %v1173_v36 = vrot.slane %v1047_v26, %v2941_v43  ;;  %v1194_v37 = vmul.f32 %v1157_v40, %v1072_v52  ;;  %v1195_v38 = vmul.f32 %v1157_v40, %v1076_v54  ;;  %v1229_v25 = vld [vmem:[#allocation7 + $0x8] sm:$0xff] }
 0x2fe   : > { %v1065_v39 = vcombine.high %v1061_v31, %v1061_v31  ;;  %v1169_v41 = vrot.slane %v1064_v33, %v2941_v43  ;;  %v1177_v42 = vrot.slane %v1061_v31, %v2941_v43  ;;  %v1181_v44 = vrot.slane %v1063_v32, %v2941_v43  ;;  %v2189_v28 = vld [vmem:[#allocation3 + $0x5] ss:$0 sm:$0xff] }
 0x2ff   : > { %v1196_v45 = vmul.f32 %v1161_v34, %v1083_v51  ;;  %v1197_v46 = vmul.f32 %v1161_v34, %v1087_v53  ;;  %v1198_v47 = vmul.f32 %v1165_v35, %v1094_v58  ;;  %v1199_v48 = vmul.f32 %v1165_v35, %v1098_v57  ;;  %1210 = vst.msk [vmem:[#allocation4] sm:$0xff] %vm465_vm1, %v1194_v37  ;;  %v3046_v51 = vld [vmem:[%s3214_s10 + $0x8] sm:$0xff]  ;;  %v2181_v53 = vld [vmem:[#allocation3 + $0x1] ss:$0 sm:$0xff]  ;;  %v1153_v57 = vpop.permute.xlu1 %1152  ;;  %v1149_v58 = vpop.permute.xlu0 %1148  ;;  %v2191_v35 = vld [vmem:[#allocation3 + $0x6] ss:$0 sm:$0xff] }
 0x300   : > { %1211 = vst.msk [vmem:[#allocation4 + $0x8] sm:$0xff] %vm465_vm1, %v1195_v38  ;;  %v1185_v52 = vrot.slane %v1065_v39, %v2941_v43  ;;  %v1200_v54 = vmul.f32 %v1169_v41, %v1105_v61  ;;  %v1201_v55 = vmul.f32 %v1169_v41, %v1109_v60  ;;  %v1202_v56 = vmul.f32 %v1173_v36, %v1116_v9 }
 0x301   : > { %v1203_v59 = vmul.f32 %v1173_v36, %v1120_v8  ;;  %v1204_v62 = vmul.f32 %v1177_v42, %v1127_v18  ;;  %v1205_v63 = vmul.f32 %v1177_v42, %v1131_v17  ;;  %v1206_v0 = vmul.f32 %v1181_v44, %v1138_v30  ;;  %1212 = vst.msk [vmem:[#allocation4 + $0x10] sm:$0xff] %vm465_vm1, %v1196_v45 }
 0x302   : > { %1213 = vst.msk [vmem:[#allocation4 + $0x18] sm:$0xff] %vm465_vm1, %v1197_v46  ;;  %1214 = vst.msk [vmem:[#allocation4 + $0x20] sm:$0xff] %vm465_vm1, %v1198_v47  ;;  %v1207_v43 = vmul.f32 %v1181_v44, %v1142_v29  ;;  %v1208_v60 = vmul.f32 %v1185_v52, %v1149_v58  ;;  %v1209_v61 = vmul.f32 %v1185_v52, %v1153_v57 }
 0x303   : > { %1215 = vst.msk [vmem:[#allocation4 + $0x28] sm:$0xff] %vm465_vm1, %v1199_v48  ;;  %1216 = vst.msk [vmem:[#allocation4 + $0x30] sm:$0xff] %vm465_vm1, %v1200_v54  ;;  %v1235_v1 = vmul.f32 %v2179_v50, %v3040_v49  ;;  %v1236_v2 = vmul.f32 %v2179_v50, %v3046_v51  ;;  %v1328_v4 = vmul.f32 %v2181_v53, %v3040_v49  ;;  %v2193_v54 = vld [vmem:[#allocation3 + $0x7] ss:$0 sm:$0xff] }
 0x304   : > { %1217 = vst.msk [vmem:[#allocation4 + $0x38] sm:$0xff] %vm465_vm1, %v1201_v55  ;;  %1218 = vst.msk [vmem:[#allocation4 + $0x40] sm:$0xff] %vm465_vm1, %v1202_v56  ;;  %v1329_v5 = vmul.f32 %v2181_v53, %v3046_v51  ;;  %v1421_v12 = vmul.f32 %v2183_v7, %v3040_v49  ;;  %v1422_v14 = vmul.f32 %v2183_v7, %v3046_v51 }
 0x305   : > { %1219 = vst.msk [vmem:[#allocation4 + $0x48] sm:$0xff] %vm465_vm1, %v1203_v59  ;;  %1220 = vst.msk [vmem:[#allocation4 + $0x50] sm:$0xff] %vm465_vm1, %v1204_v62  ;;  %v1237_v8 = vmul.f32 1.442695, %v1235_v1  ;;  %v1239_v9 = vmul.f32 1.442695, %v1236_v2  ;;  %v1514_v17 = vmul.f32 %v2185_v15, %v3040_v49  ;;  %v1515_v19 = vmul.f32 %v2185_v15, %v3046_v51 }
 0x306   : > { %1221 = vst.msk [vmem:[#allocation4 + $0x58] sm:$0xff] %vm465_vm1, %v1205_v63  ;;  %1222 = vst.msk [vmem:[#allocation4 + $0x60] sm:$0xff] %vm465_vm1, %v1206_v0  ;;  %v1330_v10 = vmul.f32 1.442695, %v1328_v4  ;;  %v1332_v13 = vmul.f32 1.442695, %v1329_v5  ;;  %v1607_v24 = vmul.f32 %v2187_v20, %v3040_v49  ;;  %v1608_v27 = vmul.f32 %v2187_v20, %v3046_v51 }
 0x307   : > { %1223 = vst.msk [vmem:[#allocation4 + $0x68] sm:$0xff] %vm465_vm1, %v1207_v43  ;;  %1224 = vst.msk [vmem:[#allocation4 + $0x70] sm:$0xff] %vm465_vm1, %v1208_v60  ;;  %2584 = vpow2.f32 %v1237_v8  ;;  %v1423_v16 = vmul.f32 1.442695, %v1421_v12  ;;  %v1425_v18 = vmul.f32 1.442695, %v1422_v14  ;;  %v1700_v34 = vmul.f32 %v2189_v28, %v3040_v49 }
 0x308   : > { %1225 = vst.msk [vmem:[#allocation4 + $0x78] sm:$0xff] %vm465_vm1, %v1209_v61  ;;  %2586 = vpow2.f32 %v1239_v9  ;;  %v1516_v23 = vmul.f32 1.442695, %v1514_v17  ;;  %v1518_v26 = vmul.f32 1.442695, %v1515_v19  ;;  %v1243_v32 = vld [vmem:[#allocation4] sm:$0xff]  ;;  %v1701_v39 = vmul.f32 %v2189_v28, %v3046_v51 }
 0x309   : > { %2588 = vpow2.f32 %v1330_v10  ;;  %v1609_v33 = vmul.f32 1.442695, %v1607_v24  ;;  %v1244_v36 = vld [vmem:[#allocation4 + $0x8] sm:$0xff]  ;;  %v1611_v38 = vmul.f32 1.442695, %v1608_v27  ;;  %v1793_v46 = vmul.f32 %v2191_v35, %v3040_v49  ;;  %v1337_v50 = vld [vmem:[#allocation4 + $0x10] sm:$0xff] }
 0x30a   : > { %2590 = vpow2.f32 %v1332_v13  ;;  %v1702_v52 = vmul.f32 1.442695, %v1700_v34  ;;  %v1338_v55 = vld [vmem:[#allocation4 + $0x18] sm:$0xff]  ;;  %v1704_v53 = vmul.f32 1.442695, %v1701_v39  ;;  %v1794_v57 = vmul.f32 %v2191_v35, %v3046_v51  ;;  %v1430_v1 = vld [vmem:[#allocation4 + $0x20] sm:$0xff] }
 0x30b   : > { %2592 = vpow2.f32 %v1423_v16  ;;  %v1886_v0 = vmul.f32 %v2193_v54, %v3040_v49  ;;  %v1247_v43 = vld [vmem:[#allocation5] sm:$0x1]  ;;  %v1795_v2 = vmul.f32 1.442695, %v1793_v46  ;;  %v1431_v4 = vld [vmem:[#allocation4 + $0x28] sm:$0xff]  ;;  %v1887_v8 = vmul.f32 %v2193_v54, %v3046_v51  ;;  %v1523_v16 = vld [vmem:[#allocation4 + $0x30] sm:$0xff] }
 0x30c   : > { %2594 = vpow2.f32 %v1425_v18  ;;  %v1797_v7 = vmul.f32 1.442695, %v1794_v57  ;;  %v1341_v13 = vld [vmem:[#allocation5 + $0x1] sm:$0x1]  ;;  %v1524_v18 = vld [vmem:[#allocation4 + $0x38] sm:$0xff] }
 0x30d   : > { %2596 = vpow2.f32 %v1516_v23  ;;  %v1888_v17 = vmul.f32 1.442695, %v1886_v0  ;;  %v1890_v19 = vmul.f32 1.442695, %v1887_v8  ;;  %v1616_v28 = vld [vmem:[#allocation4 + $0x40] sm:$0xff]  ;;  %v1996_v8 = vld [vmem:[%s3216_s12 + $0x10] sm:$0xff] }
 0x30e   : > { %2598 = vpow2.f32 %v1518_v26  ;;  %v1527_v34 = vld [vmem:[#allocation5 + $0x3] sm:$0x1]  ;;  %v1620_v46 = vld [vmem:[#allocation5 + $0x4] sm:$0x1] }
 0x30f   : > { %2600 = vpow2.f32 %v1609_v33  ;;  %v1896_v0 = vld [vmem:[#allocation4 + $0x78] sm:$0xff] }
 0x310   : > { %2602 = vpow2.f32 %v1611_v38  ;;  %v1710_v38 = vld [vmem:[#allocation4 + $0x58] sm:$0xff] }
 0x311   : > { %v2585_v29 = vpop.eup %2584  ;;  %2604 = vpow2.f32 %v1702_v52  ;;  %v1803_v52 = vld [vmem:[#allocation4 + $0x68] sm:$0xff] }
 0x312   : > { %v2587_v30 = vpop.eup %2586  ;;  %v1241_v40 = vmul.f32 %v2585_v29, %v1228_v21  ;;  %2606 = vpow2.f32 %v1704_v53  ;;  %v1617_v29 = vld [vmem:[#allocation4 + $0x48] sm:$0xff] }
 0x313   : > { %v1242_v31 = vmul.f32 %v2587_v30, %v1229_v25  ;;  %v2589_v41 = vpop.eup %2588  ;;  %2608 = vpow2.f32 %v1795_v2  ;;  %v1434_v25 = vld [vmem:[#allocation5 + $0x2] sm:$0x1]  ;;  %v1899_v2 = vld [vmem:[#allocation5 + $0x7] sm:$0x1] }
 0x314   : > { %v1245_v37 = vadd.f32 %v1243_v32, %v1241_v40  ;;  %v2591_v44 = vpop.eup %2590  ;;  %2610 = vpow2.f32 %v1797_v7 }
 0x315   : > { %v1246_v42 = vadd.f32 %v1244_v36, %v1242_v31  ;;  %v2593_v58 = vpop.eup %2592  ;;  %2612 = vpow2.f32 %v1888_v17 }
 0x316   : > { %v1334_v45 = vmul.f32 %v2589_v41, %v1245_v37  ;;  %v2595_v62 = vpop.eup %2594  ;;  %2614 = vpow2.f32 %v1890_v19 }
 0x317   : > { %v2482_v47 = vpack.c.bf16 %v1246_v42, %v1245_v37  ;;  %v1335_v48 = vmul.f32 %v2591_v44, %v1246_v42  ;;  %v2597_v9 = vpop.eup %2596  ;;  %v1709_v37 = vld [vmem:[#allocation4 + $0x50] sm:$0xff] }
 0x318   : > { %v1339_v56 = vadd.f32 %v1337_v50, %v1334_v45  ;;  %v2599_v10 = vpop.eup %2598  ;;  %v1802_v50 = vld [vmem:[#allocation4 + $0x60] sm:$0xff] }
 0x319   : > { %2483 = vmatpush3.bf16.msra.mxu1 %v2482_v47  ;;  %v1340_v59 = vadd.f32 %v1338_v55, %v1335_v48  ;;  %v2601_v20 = vpop.eup %2600 }
 0x31a   : > { %2484 = vmatprep.subr.bf16.mxu1 %v2700_v3  ;;  %v1427_v63 = vmul.f32 %v2593_v58, %v1339_v56  ;;  %v2603_v23 = vpop.eup %2602  ;;  %v1713_v58 = vld [vmem:[#allocation5 + $0x5] sm:$0x1] }
 0x31b   : > { %v2485_v60 = vpack.c.bf16 %v1340_v59, %v1339_v56  ;;  %v1428_v61 = vmul.f32 %v2595_v62, %v1340_v59  ;;  %v2605_v40 = vpop.eup %2604 }
 0x31c   : > { %2363 = vmatmul.mubr.msk.f32.vlgmr.msra.gmra.mrb[4].mxu1 %vm1013_vm6, %v1247_v43  ;;  %v1432_v5 = vadd.f32 %v1430_v1, %v1427_v63  ;;  %v2607_v32 = vpop.eup %2606  ;;  %v1895_v63 = vld [vmem:[#allocation4 + $0x70] sm:$0xff] }
 0x31d   : > { %2486 = vmatpush3.bf16.msra.mxu1 %v2485_v60  ;;  %2369 = vmatprep.mubr.msk.f32.mxu1 %vm2701_vm0, %v2702_v6  ;;  %v1433_v49 = vadd.f32 %v1431_v4, %v1428_v61  ;;  %v2609_v41 = vpop.eup %2608  ;;  %v1806_v61 = vld [vmem:[#allocation5 + $0x6] sm:$0x1]  ;;  %v1994_v4 = vld [vmem:[%s3216_s12] sm:$0xff] }
 0x31e   : > { %2487 = vmatprep.subr.bf16.mxu1 %v2700_v3  ;;  %v1520_v12 = vmul.f32 %v2597_v9, %v1432_v5  ;;  %v2611_v44 = vpop.eup %2610  ;;  %v1998_v9 = vld [vmem:[%s3216_s12 + $0x20] sm:$0xff] }
 0x31f   : > { %v2488_v14 = vpack.c.bf16 %v1433_v49, %v1432_v5  ;;  %v1521_v15 = vmul.f32 %v2599_v10, %v1433_v49  ;;  %v2613_v55 = vpop.eup %2612  ;;  %v1995_v5 = vld [vmem:[%s3216_s12 + $0x8] sm:$0xff] }
 0x320   : > { %2370 = vmatmul.mubr.msk.f32.vlgmr.msra.gmra.mrb[6].mxu1 %vm1013_vm6, %v1341_v13  ;;  %v1525_v51 = vadd.f32 %v1523_v16, %v1520_v12  ;;  %v2615_v53 = vpop.eup %2614  ;;  %v2506_v7 = vpack.c.bf16 %v1995_v5, %v1994_v4  ;;  %v1999_v10 = vld [vmem:[%s3216_s12 + $0x28] sm:$0xff]  ;;  %v2000_v13 = vld [vmem:[%s3216_s12 + $0x30] sm:$0xff] }
 0x321   : > { %2489 = vmatpush3.bf16.msra.mxu1 %v2488_v14  ;;  %2376 = vmatprep.mubr.msk.f32.mxu1 %vm2701_vm0, %v2702_v6  ;;  %v1526_v21 = vadd.f32 %v1524_v18, %v1521_v15  ;;  %v2512_v12 = vpack.c.bf16 %v1999_v10, %v1998_v9  ;;  %v2001_v14 = vld [vmem:[%s3216_s12 + $0x38] sm:$0xff]  ;;  %v2196_v18 = vmul.f32 -1.442695, %v3006_v22 }
 0x322   : > { %2493 = vmatprep.subr.bf16.mxu1 %v2700_v3  ;;  %v1613_v24 = vmul.f32 %v2601_v20, %v1525_v51  ;;  %v2515_v15 = vpack.c.bf16 %v2001_v14, %v2000_v13 }
 0x323   : > { %v2491_v26 = vpack.c.bf16 %v1526_v21, %v1525_v51  ;;  %v1614_v27 = vmul.f32 %v2603_v23, %v1526_v21  ;;  %2616 = vpow2.f32 %v2196_v18 }
 0x324   : > { %2377 = vmatmul.mubr.msk.f32.vlgmr.msra.gmra.mrb[8].mxu1 %vm1013_vm6, %v1434_v25  ;;  %v1618_v30 = vadd.f32 %v1616_v28, %v1613_v24 }
 0x325   : > { %2492 = vmatpush3.bf16.msra.mxu0 %v2491_v26  ;;  %v1619_v31 = vadd.f32 %v1617_v29, %v1614_v27  ;;  %2390 = vmatprep.mubr.msk.f32.mxu1 %vm2701_vm0, %v2702_v6 }
 0x326   : > { %2496 = vmatprep.subr.bf16.mxu0 %v2700_v3  ;;  %v1706_v33 = vmul.f32 %v2605_v40, %v1618_v30 }
 0x327   : > { %v2494_v35 = vpack.c.bf16 %v1619_v31, %v1618_v30  ;;  %v1707_v36 = vmul.f32 %v2607_v32, %v1619_v31 }
 0x328   : > { %2384 = vmatmul.mubr.msk.f32.vlgmr.msra.gmra.mrb[8].mxu0 %vm1013_vm6, %v1527_v34  ;;  %v1711_v39 = vadd.f32 %v1709_v37, %v1706_v33  ;;  %v2195_v33 = vld [vmem:[%s3215_s11] ss:$0 sm:$0xff] }
 0x329   : > { %2495 = vmatpush3.bf16.msra.mxu1 %v2494_v35  ;;  %v1712_v42 = vadd.f32 %v1710_v38, %v1707_v36  ;;  %2397 = vmatprep.mubr.msk.f32.mxu0 %vm2701_vm0, %v2702_v6  ;;  %v1984_v35 = vmul.f32 %v2195_v33, %v2966_v11 }
 0x32a   : > { %2499 = vmatprep.subr.bf16.mxu1 %v2700_v3  ;;  %v1799_v45 = vmul.f32 %v2609_v41, %v1711_v39 }
 0x32b   : > { %v2497_v47 = vpack.c.bf16 %v1712_v42, %v1711_v39  ;;  %v1800_v48 = vmul.f32 %v2611_v44, %v1712_v42 }
 0x32c   : > { %2391 = vmatmul.mubr.msk.f32.vlgmr.msra.gmra.mrb[10].mxu1 %vm1013_vm6, %v1620_v46  ;;  %v1804_v54 = vadd.f32 %v1802_v50, %v1799_v45 }
 0x32d   : > { %2498 = vmatpush3.bf16.msra.mxu0 %v2497_v47  ;;  %v1805_v56 = vadd.f32 %v1803_v52, %v1800_v48  ;;  %2404 = vmatprep.mubr.msk.f32.mxu1 %vm2701_vm0, %v2702_v6  ;;  %v2617_v25 = vpop.eup %2616 }
 0x32e   : > { %2502 = vmatprep.subr.bf16.mxu0 %v2700_v3  ;;  %v1892_v57 = vmul.f32 %v2613_v55, %v1804_v54  ;;  %v1989_v27 = vadd.f32 1.0, %v2617_v25 }
 0x32f   : > { %v2500_v59 = vpack.c.bf16 %v1805_v56, %v1804_v54  ;;  %v1893_v62 = vmul.f32 %v2615_v53, %v1805_v56 }
 0x330   : > { %2398 = vmatmul.mubr.msk.f32.vlgmr.msra.gmra.mrb[10].mxu0 %vm1013_vm6, %v1713_v58  ;;  %v1897_v43 = vadd.f32 %v1895_v63, %v1892_v57  ;;  %2618 = vrcp.f32 %v1989_v27 }
 0x331   : > { %2501 = vmatpush3.bf16.msra.mxu1 %v2500_v59  ;;  %v1898_v60 = vadd.f32 %v1896_v0, %v1893_v62  ;;  %2411 = vmatprep.mubr.msk.f32.mxu0 %vm2701_vm0, %v2702_v6 }
 0x332   : > { %1974 = vst.msk [vmem:[#allocation7] sm:$0xff] %vm465_vm1, %v1897_v43  ;;  %2505 = vmatprep.subr.bf16.mxu1 %v2700_v3 }
 0x333   : > { %v2503_v1 = vpack.c.bf16 %v1898_v60, %v1897_v43  ;;  %1975 = vst.msk [vmem:[#allocation7 + $0x8] sm:$0xff] %vm465_vm1, %v1898_v60 }
 0x334   : > { %2405 = vmatmul.mubr.msk.f32.vlgmr.msra.gmra.mrb[12].mxu1 %vm1013_vm6, %v1806_v61 }
 0x335   : > { %2504 = vmatpush3.bf16.msra.mxu0 %v2503_v1  ;;  %2430 = vmatprep.mubr.msk.f32.mxu1 %vm2701_vm0, %v2702_v6  ;;  %v1997_v6 = vld [vmem:[%s3216_s12 + $0x18] sm:$0xff] }
 0x336   : > { %2507 = vmatpush3.bf16.msra.mxu1 %v2506_v7  ;;  %v2509_v49 = vpack.c.bf16 %v1997_v6, %v1996_v8 }
 0x337   : > { %2508 = vmatprep.subr.bf16.mxu1 %v2700_v3 }
 0x338   : > { %2412 = vmatmul.mubr.msk.f32.vlgmr.msra.gmra.mrb[12].mxu0 %vm1013_vm6, %v1899_v2 }
 0x33a   : > { %2510 = vmatpush3.bf16.msra.mxu1 %v2509_v49  ;;  %v2619_v34 = vpop.eup %2618 }
 0x33b   : > { %2511 = vmatprep.subr.bf16.mxu1 %v2700_v3  ;;  %v1992_v37 = vmul.f32 %v2619_v34, %v3006_v22 }
 0x33e   : > { %2513 = vmatpush3.bf16.msra.mxu1 %v2512_v12 }
 0x33f   : > { %2514 = vmatprep.subr.bf16.mxu1 %v2700_v3 }
 0x342   : > { %2516 = vmatpush3.bf16.msra.mxu1 %v2515_v15 }
 0x3ef   : > { %v1317_v16 = vpop.f32.mrb[4].mxu1 }
 0x3f0   : > { %1322 = vst.msk [vmem:[#allocation6] sm:$0x1] %vm1321_vm9, %v1317_v16  ;;  %v2364_v17 = vpop.f32.mrb[5].mxu1 }
 0x3f3   : > { %v1411_v51 = vpop.f32.mrb[6].mxu1 }
 0x3f4   : > { %1415 = vst.msk [vmem:[#allocation6 + $0x1] sm:$0x1] %vm1321_vm9, %v1411_v51  ;;  %v2371_v19 = vpop.f32.mrb[7].mxu1 }
 0x3f7   : > { %v1504_v20 = vpop.f32.mrb[8].mxu1 }
 0x3f8   : > { %1508 = vst.msk [vmem:[#allocation6 + $0x2] sm:$0x1] %vm1321_vm9, %v1504_v20  ;;  %v2378_v21 = vpop.f32.mrb[9].mxu1 }
 0x3fb   : > { %v1597_v23 = vpop.f32.mrb[8].mxu0 }
 0x3fc   : > { %1601 = vst.msk [vmem:[#allocation6 + $0x3] sm:$0x1] %vm1321_vm9, %v1597_v23  ;;  %v2385_v3 = vpop.f32.mrb[9].mxu0 }
 0x3ff   : > { %v1690_v24 = vpop.f32.mrb[10].mxu1 }
 0x400   : > { %1694 = vst.msk [vmem:[#allocation6 + $0x4] sm:$0x1] %vm1321_vm9, %v1690_v24  ;;  %v2392_v26 = vpop.f32.mrb[11].mxu1 }
 0x403   : > { %v1783_v28 = vpop.f32.mrb[10].mxu0 }
 0x404   : > { %1787 = vst.msk [vmem:[#allocation6 + $0x5] sm:$0x1] %vm1321_vm9, %v1783_v28  ;;  %v2399_v29 = vpop.f32.mrb[11].mxu0 }
 0x407   : > { %v1876_v30 = vpop.f32.mrb[12].mxu1 }
 0x408   : > { %1880 = vst.msk [vmem:[#allocation6 + $0x6] sm:$0x1] %vm1321_vm9, %v1876_v30  ;;  %v2406_v40 = vpop.f32.mrb[13].mxu1 }
 0x40b   : > { %v1969_v31 = vpop.f32.mrb[12].mxu0 }
 0x40c   : > { %1973 = vst.msk [vmem:[#allocation6 + $0x7] sm:$0x1] %vm1321_vm9, %v1969_v31  ;;  %v2413_v32 = vpop.f32.mrb[13].mxu0 }
 0x413   : > { %v1976_v36 = vld [vmem:[#allocation6] sm:$0xff] }
 0x414   : > { %v1985_v38 = vadd.f32 %v1984_v35, %v1976_v36 }
 0x416   : > { %v1993_v39 = vmul.f32 %v1992_v37, %v1985_v38 }
 0x418   : > { %2431 = vmatmul.mubr.msk.f32.vlgmr.msra.gmra.mrb[14].mxu1 %vm465_vm1, %v1993_v39 }
 0x4eb   : > { %v2071_v11 = vpop.f32.mrb[14].mxu1 }
 0x4ec   : > { %2075 = vst.msk [vmem:[%s453_s17] sm:$0xff] %vm475_vm2, %v2071_v11  ;;  %v2432_v22 = vpop.f32.mrb[15].mxu1 }
 0x4ed   : > { %2633 = shalt.err (!%p2630_p5)
}
 0x4ee   : > { %s2634_s14 = scalar_lea.hbm %s3156_s16, 128  ;;  %s2638_s22 = scalar_lea.hbm %s3217_s13, 256 }
 0x4ef   : > { %p2635_p6 = scmp.ne.s32.totalorder %s3156_s16, %s2634_s14  ;;  %p2639_p10 = scmp.lt.u32.totalorder %s3156_s16, %s3217_s13 }
 0x4f0   : > { %p2640_p11 = scmp.lt.u32.totalorder %s2638_s22, %s2634_s14  ;;  %p2642_p13 = scmp.lt.u32.totalorder %s2634_s14, %s3156_s16 }
 0x4f1   : > { %p2636_p7 = pnand %p2635_p6, %p2815_p4 }
 0x4f2   : > { %p2641_p12 = por %p2640_p11, %p2639_p10 }
 0x4f3   : > { %p2637_p9 = pneg %p2636_p7 }
 0x4f4   : > { %p2643_p0 = por %p2642_p13, %p2641_p12 }
 0x4f6   : > { %p2644_p1 = pnand %p2643_p0, %p2637_p9 }
 0x4f8   : > { %2647 = shalt.err (!%p2644_p1)
}
 0x4f9   : > { %2517 = dma.vmem_to_hbm [thread:$0]  (%p2815_p4), %s3158_s0, 128, %s3156_s16, %s2077_s23  }
 0x4fa PF: > { %p2523_p2 = scmp.ge.s32.totalorder %s2698_s30, 2  ;;  %s2103_s24 = sand.u32 1, %s2678_s25  }
 0x4fb   : > { %s2104_s1 = scalar_lea.sflag [#allocation9], %s2103_s24 }
 0x4fc   : > { %p2520_p3 = pnand %p2523_p2, %p2822_p8 }
 0x4fe   : > { %2673 = dma.done.wait (!%p2520_p3), %s2104_s1, 128  }
 0x4ff   : > { %2675 = vsyncadd (!%p2520_p3), %s2104_s1, 4294967168  ;;  %s26_s30 = sadd.s32 1, %s2698_s30   ;;  %s3228_s18 = sld [smem:[#allocation11_spill]] }
 0x500   : > { %p23_p5 = scmp.ge.s32.totalorder %s26_s30, 4   ;;  %s3229_s25 = smov %s2682_s26 }
 0x501   : > { %s3230_s26 = smov %s2686_s27  ;;  %s3231_s27 = smov %s2828_s21 }
 0x502   : > { %s3232_s28 = smov %s2694_s29  ;;  %25 = sbr.rel (!%p23_p5) target bundleno = 8 (0x8), region = 118 }
 0x505   : > { %s3233_s29 = smov %s3228_s18 }
 0x509   :  { %2109 = vsyncpa [#allocation9], 1 }
 0x50a   :  { %2111 = vsyncpa [#allocation9 + $0x1], 1 }

</bundles_post_ra>
